<compile_context>
chip_gen: v7x
topology: tpu7x:2x2x1
jax: 0.10.0
libtpu: 0.0.40
codegen_flags: <defaults>
</compile_context>

<pallas_src>
import math

import jax
import jax.numpy as jnp
from jax.experimental import pallas as pl
from jax.experimental.pallas import tpu as pltpu

LN_EPS = 1e-5  # PyTorch nn.LayerNorm default


# ----------------------------- in-kernel helpers -----------------------------
def _layer_norm(x, gamma, beta):
    mu = jnp.mean(x, axis=-1, keepdims=True)
    var = jnp.mean((x - mu) ** 2, axis=-1, keepdims=True)
    return (x - mu) * jax.lax.rsqrt(var + LN_EPS) * gamma + beta


def _gelu(x):
    # TODO(synk): PyTorch nn.GELU defaults to the erf form; tanh approximation
    # is used here for a guaranteed Mosaic (EUP) lowering.
    return jax.nn.gelu(x, approximate=True)


def _linear_bf16(x_f32, w_ref, b_ref):
    # bf16 MXU operands, f32 accumulation, f32 bias add.  The cast feeds the
    # matmul directly so no long-lived f32+bf16 copy pair stays live.
    return jnp.dot(x_f32.astype(jnp.bfloat16), w_ref[...],
                   preferred_element_type=jnp.float32) + b_ref[...]


# ----------------------- phase 1: synthetic encoder kernel -------------------
def encoder_kernel(x_ref, bias_ref,
                   wq, bq, wk, bk, wv, bv, wo, bo, ln1_g, ln1_b,
                   w1, b1, w2, b2, ln2_g, ln2_b,
                   cls_ref):
    x_bf = x_ref[...]                                   # (Bt, S, H) bf16
    Bt, S, H = x_bf.shape

    # K / V need every token row: flatten the batch tile so the MXU sees
    # M = Bt*S rows per weight pass.
    x_flat = x_bf.reshape(Bt * S, H)
    k = (jnp.dot(x_flat, wk[...], preferred_element_type=jnp.float32)
         + bk[...]).reshape(Bt, S, H)
    v = (jnp.dot(x_flat, wv[...], preferred_element_type=jnp.float32)
         + bv[...]).reshape(Bt, S, H)

    # ---- CLS-only path from here on: only h[:, 0, :] is ever emitted and the
    # synthetic encoder is single-layer, so q / softmax / Wo / LN / FFN are
    # computed on the Bt CLS rows only. ----
    x_cls_bf = x_bf[:, 0, :]                            # (Bt, H) bf16
    x_cls = x_cls_bf.astype(jnp.float32)

    scale = 1.0 / math.sqrt(H)
    q = (jnp.dot(x_cls_bf, wq[...], preferred_element_type=jnp.float32)
         + bq[...]) * scale                             # fold 1/sqrt(H) into q

    # scores[b, s] = <q[b], k[b, s]> : VPU mul + lane reduce (avoids M=1
    # batched MXU matmuls), plus the precomputed additive mask bias.
    bias = bias_ref[...].reshape(Bt, S)                 # (Bt, S) f32
    scores = jnp.sum(q[:, None, :] * k, axis=-1) + bias

    m = jnp.max(scores, axis=-1, keepdims=True)
    e = jnp.exp(scores - m)
    denom = jnp.sum(e, axis=-1, keepdims=True)
    # ctx[b, d] = sum_s p[b, s] * v[b, s, d]; normalize AFTER the contraction,
    # reciprocal on the (otherwise idle) EUP slot.
    ctx = jnp.sum(e[:, :, None] * v, axis=1)            # (Bt, H)
    ctx = ctx * pl.reciprocal(denom, approx=True)

    attn_out = _linear_bf16(ctx, wo, bo)
    h = _layer_norm(x_cls + attn_out, ln1_g[...], ln1_b[...])
    ffn = _linear_bf16(_gelu(_linear_bf16(h, w1, b1)), w2, b2)
    h = _layer_norm(h + ffn, ln2_g[...], ln2_b[...])

    cls_ref[...] = h                                    # (Bt, H) sublane-dense


# ----------------------- phase 2: EnhancedProjection kernel ------------------
def projection_kernel(x_ref,
                      wi, bi, ln1_g, ln1_b,
                      wa1, ba1, wa2, ba2, lna_g, lna_b,
                      wb1, bb1, wb2, bb2, lnb_g, lnb_b,
                      wout, bout, fln_g, fln_b,
                      o_ref):
    x = x_ref[...]               # (rt, H) f32 row tile of CLS vectors

    p = _layer_norm(_linear_bf16(x, wi, bi), ln1_g[...], ln1_b[...])

    r = p                                              # Dropout == identity
    p = _linear_bf16(_gelu(_linear_bf16(p, wa1, ba1)), wa2, ba2)
    p = _layer_norm(p + r, lna_g[...], lna_b[...])

    r = p
    p = _linear_bf16(_gelu(_linear_bf16(p, wb1, bb1)), wb2, bb2)
    p = _layer_norm(p + r, lnb_g[...], lnb_b[...])

    o_ref[...] = _layer_norm(_linear_bf16(p, wout, bout), fln_g[...], fln_b[...])


# ------------------------------- parameter init -------------------------------
def _lin(key, din, dout, scale=0.02):
    w = (scale * jax.random.normal(key, (din, dout))).astype(jnp.bfloat16)
    b = jnp.zeros((1, dout), jnp.float32)
    return [w, b]


def _ln(dim):
    return [jnp.ones((1, dim), jnp.float32), jnp.zeros((1, dim), jnp.float32)]


def make_params(key, vocab, max_seq, hidden, out_dim):
    keys = jax.random.split(key, 16)
    p = {}
    p["tok_emb"] = (0.02 * jax.random.normal(keys[0], (vocab, hidden))).astype(jnp.float32)
    p["pos_emb"] = (0.02 * jax.random.normal(keys[1], (max_seq, hidden))).astype(jnp.float32)

    enc = []
    for i in range(4):                                  # Wq Wk Wv Wo
        enc += _lin(keys[2 + i], hidden, hidden)
    enc += _ln(hidden)                                  # post-attn LN
    enc += _lin(keys[6], hidden, 4 * hidden)            # FFN in
    enc += _lin(keys[7], 4 * hidden, hidden)            # FFN out
    enc += _ln(hidden)                                  # post-FFN LN
    p["enc"] = enc

    proj = []
    proj += _lin(keys[8], hidden, hidden)               # input_proj
    proj += _ln(hidden)                                 # layer_norm1
    proj += _lin(keys[9], hidden, 4 * hidden)           # projection_layers[0]
    proj += _lin(keys[10], 4 * hidden, hidden)
    proj += _ln(hidden)                                 # layer_norms[0]
    proj += _lin(keys[11], hidden, 4 * hidden)          # projection_layers[1]
    proj += _lin(keys[12], 4 * hidden, hidden)
    proj += _ln(hidden)                                 # layer_norms[1]
    proj += _lin(keys[13], hidden, out_dim)             # output_proj
    proj += _ln(out_dim)                                # final_layer_norm
    p["proj"] = proj
    return p


# ---------------------------------- wrapper -----------------------------------
def _const_spec(a, single_buffer):
    # Full-array block, constant index_map -> stays VMEM-resident across steps.
    # With single_buffer the spec requests one VMEM buffer (the block index
    # never changes, so no prefetch buffer is needed) -> half the resident
    # weight footprint (matters on v7x's 64 MiB per-TC VMEM).
    idx = lambda *_: (0,) * a.ndim
    if single_buffer:
        return pl.BlockSpec(a.shape, idx, pipeline_mode=pl.Buffered(1))
    return pl.BlockSpec(a.shape, idx)


def _run_with_weight_single_buffering(builder):
    try:
        return builder(True)
    except Exception:
        # TODO(synk): pl.Buffered(1) pipeline_mode rejected by this JAX build;
        # fall back to default double-buffered resident weights.
        return builder(False)


def _vmem_limit_bytes():
    # Adapt the scoped-VMEM cap to the chip: ~96 MiB on v5e/v6e (128 MiB
    # physical), ~48 MiB on v7x (64 MiB per-TC).
    try:
        cap = getattr(pltpu.get_tpu_info(), "vmem_capacity_bytes", None)
        if cap:
            return min((int(cap) * 3) // 4, 100 * 1024 * 1024)
    except Exception:
        pass
    return 48 * 1024 * 1024


def language_specific_encoder(input_ids, attention_mask, params, out_dim,
                              batch_tile=16, row_tile=256):
    B, S = input_ids.shape
    H = params["tok_emb"].shape[1]

    # Embedding lookup (gather) is glue, stays in plain JAX.  Activations are
    # streamed into phase 1 as bf16 (matmul operands are bf16 anyway; f32 is
    # recovered in-kernel only for the residual / LayerNorm path).
    x = (params["tok_emb"][input_ids]
         + params["pos_emb"][:S][None, :, :]).astype(jnp.bfloat16)
    # Additive attention-mask bias hoisted out of the kernel (computed once).
    bias = ((1.0 - attention_mask.astype(jnp.float32)) * -1e9).reshape(B, 1, S)

    enc_params = params["enc"]
    proj_params = params["proj"]

    cparams = pltpu.CompilerParams(
        dimension_semantics=("parallel",),          # megacore-sharded on v7x
        vmem_limit_bytes=_vmem_limit_bytes())

    # ---- phase 1: encoder, batch-tiled grid, emits sublane-dense CLS rows ----
    bt = min(batch_tile, B)
    bp = pl.cdiv(B, bt) * bt
    if bp != B:
        x = jnp.pad(x, ((0, bp - B), (0, 0), (0, 0)))
        bias = jnp.pad(bias, ((0, bp - B), (0, 0), (0, 0)))   # pad rows discarded

    def phase1(single_buffer):
        return pl.pallas_call(
            encoder_kernel,
            out_shape=jax.ShapeDtypeStruct((bp, H), jnp.float32),
            grid_spec=pltpu.PrefetchScalarGridSpec(
                num_scalar_prefetch=0,
                grid=(bp // bt,),
                in_specs=[pl.BlockSpec((bt, S, H), lambda b: (b, 0, 0)),
                          pl.BlockSpec((bt, 1, S), lambda b: (b, 0, 0))]
                         + [_const_spec(a, single_buffer) for a in enc_params],
                out_specs=pl.BlockSpec((bt, H), lambda b: (b, 0))),
            compiler_params=cparams,
        )(x, bias, *enc_params)

    cls = _run_with_weight_single_buffering(phase1)[:B]

    # ---- phase 2: EnhancedProjection over CLS rows, large row tiles ----
    rt = min(row_tile, pl.cdiv(B, 8) * 8)   # one/few grid steps; v5e: 128 also fine
    rows = pl.cdiv(B, rt) * rt
    cls_pad = jnp.pad(cls, ((0, rows - B), (0, 0))) if rows != B else cls

    def phase2(single_buffer):
        return pl.pallas_call(
            projection_kernel,
            out_shape=jax.ShapeDtypeStruct((rows, out_dim), jnp.float32),
            grid_spec=pltpu.PrefetchScalarGridSpec(
                num_scalar_prefetch=0,
                grid=(rows // rt,),
                in_specs=[pl.BlockSpec((rt, H), lambda i: (i, 0))]
                         + [_const_spec(a, single_buffer) for a in proj_params],
                out_specs=pl.BlockSpec((rt, out_dim), lambda i: (i, 0))),
            compiler_params=cparams,
        )(cls_pad, *proj_params)

    return _run_with_weight_single_buffering(phase2)[:B]


# ------------------------------------ main ------------------------------------
if __name__ == "__main__":
    # H / OUT chosen 128-aligned (lane-dense); at real BERT sizes (H=768) the
    # hidden dim is already a multiple of 128.
    B, S, H, OUT, VOCAB = 2, 8, 128, 128, 64

    key = jax.random.PRNGKey(0)
    k_ids, k_params = jax.random.split(key)

    input_ids = jax.random.randint(k_ids, (B, S), 0, VOCAB, dtype=jnp.int32)
    lengths = jnp.array([S, 5], dtype=jnp.int32)
    attention_mask = (jnp.arange(S)[None, :] < lengths[:, None]).astype(jnp.int32)

    params = make_params(k_params, VOCAB, S, H, OUT)

    out = language_specific_encoder(input_ids, attention_mask, params, OUT)
    out = jax.block_until_ready(out)

    assert out.shape == (B, OUT) and out.dtype == jnp.float32
    assert bool(jnp.all(jnp.isfinite(out)))
    print("KERNEL_OK")
</pallas_src>

<mosaic_0001>
module attributes {stable_mosaic.version = 11 : i64} {
  func.func @encoder_kernel(%arg0: i32, %arg1: memref<2x8x128xbf16, #tpu.memory_space<vmem>>, %arg2: memref<2x1x8xf32, #tpu.memory_space<vmem>>, %arg3: memref<128x128xbf16, #tpu.memory_space<vmem>>, %arg4: memref<1x128xf32, #tpu.memory_space<vmem>>, %arg5: memref<128x128xbf16, #tpu.memory_space<vmem>>, %arg6: memref<1x128xf32, #tpu.memory_space<vmem>>, %arg7: memref<128x128xbf16, #tpu.memory_space<vmem>>, %arg8: memref<1x128xf32, #tpu.memory_space<vmem>>, %arg9: memref<128x128xbf16, #tpu.memory_space<vmem>>, %arg10: memref<1x128xf32, #tpu.memory_space<vmem>>, %arg11: memref<1x128xf32, #tpu.memory_space<vmem>>, %arg12: memref<1x128xf32, #tpu.memory_space<vmem>>, %arg13: memref<128x512xbf16, #tpu.memory_space<vmem>>, %arg14: memref<1x512xf32, #tpu.memory_space<vmem>>, %arg15: memref<512x128xbf16, #tpu.memory_space<vmem>>, %arg16: memref<1x128xf32, #tpu.memory_space<vmem>>, %arg17: memref<1x128xf32, #tpu.memory_space<vmem>>, %arg18: memref<1x128xf32, #tpu.memory_space<vmem>>, %arg19: memref<2x128xf32, #tpu.memory_space<vmem>>) attributes {dimension_semantics = [#tpu.dimension_semantics<parallel>], iteration_bounds = array<i64: 1>, scalar_prefetch = 0 : i64, scratch_operands = 0 : i64, tpu.core_type = #tpu.core_type<tc>, window_params = [{transform_indices = @transform_0, window_bounds = array<i64: 2, 8, 128>}, {transform_indices = @transform_1, window_bounds = array<i64: 2, 1, 8>}, {pipeline_mode = #tpu.pipeline_mode<synchronous>, transform_indices = @transform_2, window_bounds = array<i64: 128, 128>}, {pipeline_mode = #tpu.pipeline_mode<synchronous>, transform_indices = @transform_3, window_bounds = array<i64: 1, 128>}, {pipeline_mode = #tpu.pipeline_mode<synchronous>, transform_indices = @transform_4, window_bounds = array<i64: 128, 128>}, {pipeline_mode = #tpu.pipeline_mode<synchronous>, transform_indices = @transform_5, window_bounds = array<i64: 1, 128>}, {pipeline_mode = #tpu.pipeline_mode<synchronous>, transform_indices = @transform_6, window_bounds = array<i64: 128, 128>}, {pipeline_mode = #tpu.pipeline_mode<synchronous>, transform_indices = @transform_7, window_bounds = array<i64: 1, 128>}, {pipeline_mode = #tpu.pipeline_mode<synchronous>, transform_indices = @transform_8, window_bounds = array<i64: 128, 128>}, {pipeline_mode = #tpu.pipeline_mode<synchronous>, transform_indices = @transform_9, window_bounds = array<i64: 1, 128>}, {pipeline_mode = #tpu.pipeline_mode<synchronous>, transform_indices = @transform_10, window_bounds = array<i64: 1, 128>}, {pipeline_mode = #tpu.pipeline_mode<synchronous>, transform_indices = @transform_11, window_bounds = array<i64: 1, 128>}, {pipeline_mode = #tpu.pipeline_mode<synchronous>, transform_indices = @transform_12, window_bounds = array<i64: 128, 512>}, {pipeline_mode = #tpu.pipeline_mode<synchronous>, transform_indices = @transform_13, window_bounds = array<i64: 1, 512>}, {pipeline_mode = #tpu.pipeline_mode<synchronous>, transform_indices = @transform_14, window_bounds = array<i64: 512, 128>}, {pipeline_mode = #tpu.pipeline_mode<synchronous>, transform_indices = @transform_15, window_bounds = array<i64: 1, 128>}, {pipeline_mode = #tpu.pipeline_mode<synchronous>, transform_indices = @transform_16, window_bounds = array<i64: 1, 128>}, {pipeline_mode = #tpu.pipeline_mode<synchronous>, transform_indices = @transform_17, window_bounds = array<i64: 1, 128>}, {transform_indices = @transform_18, window_bounds = array<i64: 2, 128>}]} {
    %c0 = arith.constant 0 : index
    %c0_0 = arith.constant 0 : index
    %c0_1 = arith.constant 0 : index
    %0 = vector.load %arg1[%c0, %c0_0, %c0_1] : memref<2x8x128xbf16, #tpu.memory_space<vmem>>, vector<2x8x128xbf16>
    %1 = vector.shape_cast %0 : vector<2x8x128xbf16> to vector<16x128xbf16>
    %c0_2 = arith.constant 0 : index
    %c0_3 = arith.constant 0 : index
    %2 = vector.load %arg5[%c0_2, %c0_3] : memref<128x128xbf16, #tpu.memory_space<vmem>>, vector<128x128xbf16>
    %cst = arith.constant dense<0.000000e+00> : vector<16x128xf32>
    %3 = tpu.matmul %1, %2, %cst {dimension_numbers = #tpu.dot_dimension_numbers<[1], [0], [0], [1], [0, 0, 1, 1], [], []>} : vector<16x128xbf16>, vector<128x128xbf16>, vector<16x128xf32> -> vector<16x128xf32>
    %c0_4 = arith.constant 0 : index
    %c0_5 = arith.constant 0 : index
    %4 = vector.load %arg6[%c0_4, %c0_5] : memref<1x128xf32, #tpu.memory_space<vmem>>, vector<1x128xf32>
    %5 = vector.broadcast %4 : vector<1x128xf32> to vector<16x128xf32>
    %6 = arith.addf %3, %5 : vector<16x128xf32>
    %7 = vector.shape_cast %6 : vector<16x128xf32> to vector<2x8x128xf32>
    %c0_6 = arith.constant 0 : index
    %c0_7 = arith.constant 0 : index
    %8 = vector.load %arg7[%c0_6, %c0_7] : memref<128x128xbf16, #tpu.memory_space<vmem>>, vector<128x128xbf16>
    %cst_8 = arith.constant dense<0.000000e+00> : vector<16x128xf32>
    %9 = tpu.matmul %1, %8, %cst_8 {dimension_numbers = #tpu.dot_dimension_numbers<[1], [0], [0], [1], [0, 0, 1, 1], [], []>} : vector<16x128xbf16>, vector<128x128xbf16>, vector<16x128xf32> -> vector<16x128xf32>
    %c0_9 = arith.constant 0 : index
    %c0_10 = arith.constant 0 : index
    %10 = vector.load %arg8[%c0_9, %c0_10] : memref<1x128xf32, #tpu.memory_space<vmem>>, vector<1x128xf32>
    %11 = vector.broadcast %10 : vector<1x128xf32> to vector<16x128xf32>
    %12 = arith.addf %9, %11 : vector<16x128xf32>
    %13 = vector.shape_cast %12 : vector<16x128xf32> to vector<2x8x128xf32>
    %14 = vector.extract_strided_slice %0 {offsets = [0, 0, 0], sizes = [2, 1, 128], strides = [1, 1, 1]} : vector<2x8x128xbf16> to vector<2x1x128xbf16>
    %15 = vector.shape_cast %14 : vector<2x1x128xbf16> to vector<2x128xbf16>
    %16 = arith.extf %15 : vector<2x128xbf16> to vector<2x128xf32>
    %c0_11 = arith.constant 0 : index
    %c0_12 = arith.constant 0 : index
    %17 = vector.load %arg3[%c0_11, %c0_12] : memref<128x128xbf16, #tpu.memory_space<vmem>>, vector<128x128xbf16>
    %cst_13 = arith.constant dense<0.000000e+00> : vector<2x128xf32>
    %18 = tpu.matmul %15, %17, %cst_13 {dimension_numbers = #tpu.dot_dimension_numbers<[1], [0], [0], [1], [0, 0, 1, 1], [], []>} : vector<2x128xbf16>, vector<128x128xbf16>, vector<2x128xf32> -> vector<2x128xf32>
    %c0_14 = arith.constant 0 : index
    %c0_15 = arith.constant 0 : index
    %19 = vector.load %arg4[%c0_14, %c0_15] : memref<1x128xf32, #tpu.memory_space<vmem>>, vector<1x128xf32>
    %20 = vector.broadcast %19 : vector<1x128xf32> to vector<2x128xf32>
    %21 = arith.addf %18, %20 : vector<2x128xf32>
    %cst_16 = arith.constant 0.0883883461 : f32
    %22 = vector.broadcast %cst_16 : f32 to vector<2x128xf32>
    %23 = arith.mulf %21, %22 : vector<2x128xf32>
    %c0_17 = arith.constant 0 : index
    %c0_18 = arith.constant 0 : index
    %c0_19 = arith.constant 0 : index
    %24 = vector.load %arg2[%c0_17, %c0_18, %c0_19] : memref<2x1x8xf32, #tpu.memory_space<vmem>>, vector<2x1x8xf32>
    %25 = vector.shape_cast %24 : vector<2x1x8xf32> to vector<2x8xf32>
    %26 = vector.shape_cast %23 : vector<2x128xf32> to vector<2x1x128xf32>
    %27 = vector.broadcast %26 : vector<2x1x128xf32> to vector<2x8x128xf32>
    %28 = arith.mulf %27, %7 : vector<2x8x128xf32>
    %cst_20 = arith.constant dense<0.000000e+00> : vector<2x8xf32>
    %29 = vector.multi_reduction <add>, %28, %cst_20 [2] : vector<2x8x128xf32> to vector<2x8xf32>
    %30 = arith.addf %29, %25 : vector<2x8xf32>
    %cst_21 = arith.constant dense<0xFF800000> : vector<2xf32>
    %31 = vector.multi_reduction <maximumf>, %30, %cst_21 [1] : vector<2x8xf32> to vector<2xf32>
    %32 = vector.shape_cast %31 : vector<2xf32> to vector<2x1xf32>
    %33 = vector.broadcast %32 : vector<2x1xf32> to vector<2x8xf32>
    %34 = arith.subf %30, %33 : vector<2x8xf32>
    %35 = math.exp %34 : vector<2x8xf32>
    %cst_22 = arith.constant dense<0.000000e+00> : vector<2xf32>
    %36 = vector.multi_reduction <add>, %35, %cst_22 [1] : vector<2x8xf32> to vector<2xf32>
    %37 = vector.shape_cast %36 : vector<2xf32> to vector<2x1xf32>
    %38 = vector.shape_cast %35 : vector<2x8xf32> to vector<2x8x1xf32>
    %39 = vector.broadcast %38 : vector<2x8x1xf32> to vector<2x8x128xf32>
    %40 = arith.mulf %39, %13 : vector<2x8x128xf32>
    %cst_23 = arith.constant dense<0.000000e+00> : vector<2x128xf32>
    %41 = vector.multi_reduction <add>, %40, %cst_23 [1] : vector<2x8x128xf32> to vector<2x128xf32>
    %42 = tpu.reciprocal %37 {approx = true} : vector<2x1xf32> -> vector<2x1xf32>
    %43 = vector.broadcast %42 : vector<2x1xf32> to vector<2x128xf32>
    %44 = arith.mulf %41, %43 : vector<2x128xf32>
    %45 = arith.truncf %44 : vector<2x128xf32> to vector<2x128xbf16>
    %c0_24 = arith.constant 0 : index
    %c0_25 = arith.constant 0 : index
    %46 = vector.load %arg9[%c0_24, %c0_25] : memref<128x128xbf16, #tpu.memory_space<vmem>>, vector<128x128xbf16>
    %cst_26 = arith.constant dense<0.000000e+00> : vector<2x128xf32>
    %47 = tpu.matmul %45, %46, %cst_26 {dimension_numbers = #tpu.dot_dimension_numbers<[1], [0], [0], [1], [0, 0, 1, 1], [], []>} : vector<2x128xbf16>, vector<128x128xbf16>, vector<2x128xf32> -> vector<2x128xf32>
    %c0_27 = arith.constant 0 : index
    %c0_28 = arith.constant 0 : index
    %48 = vector.load %arg10[%c0_27, %c0_28] : memref<1x128xf32, #tpu.memory_space<vmem>>, vector<1x128xf32>
    %49 = vector.broadcast %48 : vector<1x128xf32> to vector<2x128xf32>
    %50 = arith.addf %47, %49 : vector<2x128xf32>
    %51 = arith.addf %16, %50 : vector<2x128xf32>
    %c0_29 = arith.constant 0 : index
    %c0_30 = arith.constant 0 : index
    %52 = vector.load %arg11[%c0_29, %c0_30] : memref<1x128xf32, #tpu.memory_space<vmem>>, vector<1x128xf32>
    %c0_31 = arith.constant 0 : index
    %c0_32 = arith.constant 0 : index
    %53 = vector.load %arg12[%c0_31, %c0_32] : memref<1x128xf32, #tpu.memory_space<vmem>>, vector<1x128xf32>
    %cst_33 = arith.constant dense<0.000000e+00> : vector<2xf32>
    %54 = vector.multi_reduction <add>, %51, %cst_33 [1] : vector<2x128xf32> to vector<2xf32>
    %55 = vector.shape_cast %54 : vector<2xf32> to vector<2x1xf32>
    %cst_34 = arith.constant 1.280000e+02 : f32
    %56 = vector.broadcast %cst_34 : f32 to vector<2x1xf32>
    %57 = arith.divf %55, %56 : vector<2x1xf32>
    %58 = vector.broadcast %57 : vector<2x1xf32> to vector<2x128xf32>
    %59 = arith.subf %51, %58 : vector<2x128xf32>
    %60 = arith.mulf %59, %59 : vector<2x128xf32>
    %cst_35 = arith.constant dense<0.000000e+00> : vector<2xf32>
    %61 = vector.multi_reduction <add>, %60, %cst_35 [1] : vector<2x128xf32> to vector<2xf32>
    %62 = vector.shape_cast %61 : vector<2xf32> to vector<2x1xf32>
    %cst_36 = arith.constant 1.280000e+02 : f32
    %63 = vector.broadcast %cst_36 : f32 to vector<2x1xf32>
    %64 = arith.divf %62, %63 : vector<2x1xf32>
    %65 = vector.broadcast %57 : vector<2x1xf32> to vector<2x128xf32>
    %66 = arith.subf %51, %65 : vector<2x128xf32>
    %cst_37 = arith.constant 9.99999974E-6 : f32
    %67 = vector.broadcast %cst_37 : f32 to vector<2x1xf32>
    %68 = arith.addf %64, %67 : vector<2x1xf32>
    %69 = math.rsqrt %68 : vector<2x1xf32>
    %70 = vector.broadcast %69 : vector<2x1xf32> to vector<2x128xf32>
    %71 = arith.mulf %66, %70 : vector<2x128xf32>
    %72 = vector.broadcast %52 : vector<1x128xf32> to vector<2x128xf32>
    %73 = arith.mulf %71, %72 : vector<2x128xf32>
    %74 = vector.broadcast %53 : vector<1x128xf32> to vector<2x128xf32>
    %75 = arith.addf %73, %74 : vector<2x128xf32>
    %76 = arith.truncf %75 : vector<2x128xf32> to vector<2x128xbf16>
    %c0_38 = arith.constant 0 : index
    %c0_39 = arith.constant 0 : index
    %77 = vector.load %arg13[%c0_38, %c0_39] : memref<128x512xbf16, #tpu.memory_space<vmem>>, vector<128x512xbf16>
    %cst_40 = arith.constant dense<0.000000e+00> : vector<2x512xf32>
    %78 = tpu.matmul %76, %77, %cst_40 {dimension_numbers = #tpu.dot_dimension_numbers<[1], [0], [0], [1], [0, 0, 1, 1], [], []>} : vector<2x128xbf16>, vector<128x512xbf16>, vector<2x512xf32> -> vector<2x512xf32>
    %c0_41 = arith.constant 0 : index
    %c0_42 = arith.constant 0 : index
    %79 = vector.load %arg14[%c0_41, %c0_42] : memref<1x512xf32, #tpu.memory_space<vmem>>, vector<1x512xf32>
    %80 = vector.broadcast %79 : vector<1x512xf32> to vector<2x512xf32>
    %81 = arith.addf %78, %80 : vector<2x512xf32>
    %82 = arith.mulf %81, %81 : vector<2x512xf32>
    %83 = arith.mulf %81, %82 : vector<2x512xf32>
    %cst_43 = arith.constant 4.471500e-02 : f32
    %84 = vector.broadcast %cst_43 : f32 to vector<2x512xf32>
    %85 = arith.mulf %84, %83 : vector<2x512xf32>
    %86 = arith.addf %81, %85 : vector<2x512xf32>
    %cst_44 = arith.constant 0.797884583 : f32
    %87 = vector.broadcast %cst_44 : f32 to vector<2x512xf32>
    %88 = arith.mulf %87, %86 : vector<2x512xf32>
    %89 = math.tanh %88 : vector<2x512xf32>
    %cst_45 = arith.constant 1.000000e+00 : f32
    %90 = vector.broadcast %cst_45 : f32 to vector<2x512xf32>
    %91 = arith.addf %90, %89 : vector<2x512xf32>
    %cst_46 = arith.constant 5.000000e-01 : f32
    %92 = vector.broadcast %cst_46 : f32 to vector<2x512xf32>
    %93 = arith.mulf %92, %91 : vector<2x512xf32>
    %94 = arith.mulf %81, %93 : vector<2x512xf32>
    %95 = arith.truncf %94 : vector<2x512xf32> to vector<2x512xbf16>
    %c0_47 = arith.constant 0 : index
    %c0_48 = arith.constant 0 : index
    %96 = vector.load %arg15[%c0_47, %c0_48] : memref<512x128xbf16, #tpu.memory_space<vmem>>, vector<512x128xbf16>
    %cst_49 = arith.constant dense<0.000000e+00> : vector<2x128xf32>
    %97 = tpu.matmul %95, %96, %cst_49 {dimension_numbers = #tpu.dot_dimension_numbers<[1], [0], [0], [1], [0, 0, 1, 1], [], []>} : vector<2x512xbf16>, vector<512x128xbf16>, vector<2x128xf32> -> vector<2x128xf32>
    %c0_50 = arith.constant 0 : index
    %c0_51 = arith.constant 0 : index
    %98 = vector.load %arg16[%c0_50, %c0_51] : memref<1x128xf32, #tpu.memory_space<vmem>>, vector<1x128xf32>
    %99 = vector.broadcast %98 : vector<1x128xf32> to vector<2x128xf32>
    %100 = arith.addf %97, %99 : vector<2x128xf32>
    %101 = arith.addf %75, %100 : vector<2x128xf32>
    %c0_52 = arith.constant 0 : index
    %c0_53 = arith.constant 0 : index
    %102 = vector.load %arg17[%c0_52, %c0_53] : memref<1x128xf32, #tpu.memory_space<vmem>>, vector<1x128xf32>
    %c0_54 = arith.constant 0 : index
    %c0_55 = arith.constant 0 : index
    %103 = vector.load %arg18[%c0_54, %c0_55] : memref<1x128xf32, #tpu.memory_space<vmem>>, vector<1x128xf32>
    %cst_56 = arith.constant dense<0.000000e+00> : vector<2xf32>
    %104 = vector.multi_reduction <add>, %101, %cst_56 [1] : vector<2x128xf32> to vector<2xf32>
    %105 = vector.shape_cast %104 : vector<2xf32> to vector<2x1xf32>
    %cst_57 = arith.constant 1.280000e+02 : f32
    %106 = vector.broadcast %cst_57 : f32 to vector<2x1xf32>
    %107 = arith.divf %105, %106 : vector<2x1xf32>
    %108 = vector.broadcast %107 : vector<2x1xf32> to vector<2x128xf32>
    %109 = arith.subf %101, %108 : vector<2x128xf32>
    %110 = arith.mulf %109, %109 : vector<2x128xf32>
    %cst_58 = arith.constant dense<0.000000e+00> : vector<2xf32>
    %111 = vector.multi_reduction <add>, %110, %cst_58 [1] : vector<2x128xf32> to vector<2xf32>
    %112 = vector.shape_cast %111 : vector<2xf32> to vector<2x1xf32>
    %cst_59 = arith.constant 1.280000e+02 : f32
    %113 = vector.broadcast %cst_59 : f32 to vector<2x1xf32>
    %114 = arith.divf %112, %113 : vector<2x1xf32>
    %115 = vector.broadcast %107 : vector<2x1xf32> to vector<2x128xf32>
    %116 = arith.subf %101, %115 : vector<2x128xf32>
    %cst_60 = arith.constant 9.99999974E-6 : f32
    %117 = vector.broadcast %cst_60 : f32 to vector<2x1xf32>
    %118 = arith.addf %114, %117 : vector<2x1xf32>
    %119 = math.rsqrt %118 : vector<2x1xf32>
    %120 = vector.broadcast %119 : vector<2x1xf32> to vector<2x128xf32>
    %121 = arith.mulf %116, %120 : vector<2x128xf32>
    %122 = vector.broadcast %102 : vector<1x128xf32> to vector<2x128xf32>
    %123 = arith.mulf %121, %122 : vector<2x128xf32>
    %124 = vector.broadcast %103 : vector<1x128xf32> to vector<2x128xf32>
    %125 = arith.addf %123, %124 : vector<2x128xf32>
    %c0_61 = arith.constant 0 : index
    %c0_62 = arith.constant 0 : index
    %126 = vector.load %arg19[%c0_61, %c0_62] : memref<2x128xf32, #tpu.memory_space<vmem>>, vector<2x128xf32>
    tpu.vector_store %arg19[%c0_61, %c0_62], %125 {strides = array<i32>} : memref<2x128xf32, #tpu.memory_space<vmem>>, vector<2x128xf32>,
    return
  }
  func.func @transform_0(%arg0: i32) -> (i32, i32, i32) {
    %c0_i32 = arith.constant 0 : i32
    %c0_i32_0 = arith.constant 0 : i32
    %c0_i32_1 = arith.constant 0 : i32
    return %arg0, %c0_i32, %c0_i32_0 : i32, i32, i32
  }
  func.func @transform_1(%arg0: i32) -> (i32, i32, i32) {
    %c0_i32 = arith.constant 0 : i32
    %c0_i32_0 = arith.constant 0 : i32
    %c0_i32_1 = arith.constant 0 : i32
    return %arg0, %c0_i32, %c0_i32_0 : i32, i32, i32
  }
  func.func @transform_2(%arg0: i32) -> (i32, i32) {
    %c0_i32 = arith.constant 0 : i32
    %c0_i32_0 = arith.constant 0 : i32
    %c0_i32_1 = arith.constant 0 : i32
    return %c0_i32, %c0_i32_0 : i32, i32
  }
  func.func @transform_3(%arg0: i32) -> (i32, i32) {
    %c0_i32 = arith.constant 0 : i32
    %c0_i32_0 = arith.constant 0 : i32
    %c0_i32_1 = arith.constant 0 : i32
    return %c0_i32, %c0_i32_0 : i32, i32
  }
  func.func @transform_4(%arg0: i32) -> (i32, i32) {
    %c0_i32 = arith.constant 0 : i32
    %c0_i32_0 = arith.constant 0 : i32
    %c0_i32_1 = arith.constant 0 : i32
    return %c0_i32, %c0_i32_0 : i32, i32
  }
  func.func @transform_5(%arg0: i32) -> (i32, i32) {
    %c0_i32 = arith.constant 0 : i32
    %c0_i32_0 = arith.constant 0 : i32
    %c0_i32_1 = arith.constant 0 : i32
    return %c0_i32, %c0_i32_0 : i32, i32
  }
  func.func @transform_6(%arg0: i32) -> (i32, i32) {
    %c0_i32 = arith.constant 0 : i32
    %c0_i32_0 = arith.constant 0 : i32
    %c0_i32_1 = arith.constant 0 : i32
    return %c0_i32, %c0_i32_0 : i32, i32
  }
  func.func @transform_7(%arg0: i32) -> (i32, i32) {
    %c0_i32 = arith.constant 0 : i32
    %c0_i32_0 = arith.constant 0 : i32
    %c0_i32_1 = arith.constant 0 : i32
    return %c0_i32, %c0_i32_0 : i32, i32
  }
  func.func @transform_8(%arg0: i32) -> (i32, i32) {
    %c0_i32 = arith.constant 0 : i32
    %c0_i32_0 = arith.constant 0 : i32
    %c0_i32_1 = arith.constant 0 : i32
    return %c0_i32, %c0_i32_0 : i32, i32
  }
  func.func @transform_9(%arg0: i32) -> (i32, i32) {
    %c0_i32 = arith.constant 0 : i32
    %c0_i32_0 = arith.constant 0 : i32
    %c0_i32_1 = arith.constant 0 : i32
    return %c0_i32, %c0_i32_0 : i32, i32
  }
  func.func @transform_10(%arg0: i32) -> (i32, i32) {
    %c0_i32 = arith.constant 0 : i32
    %c0_i32_0 = arith.constant 0 : i32
    %c0_i32_1 = arith.constant 0 : i32
    return %c0_i32, %c0_i32_0 : i32, i32
  }
  func.func @transform_11(%arg0: i32) -> (i32, i32) {
    %c0_i32 = arith.constant 0 : i32
    %c0_i32_0 = arith.constant 0 : i32
    %c0_i32_1 = arith.constant 0 : i32
    return %c0_i32, %c0_i32_0 : i32, i32
  }
  func.func @transform_12(%arg0: i32) -> (i32, i32) {
    %c0_i32 = arith.constant 0 : i32
    %c0_i32_0 = arith.constant 0 : i32
    %c0_i32_1 = arith.constant 0 : i32
    return %c0_i32, %c0_i32_0 : i32, i32
  }
  func.func @transform_13(%arg0: i32) -> (i32, i32) {
    %c0_i32 = arith.constant 0 : i32
    %c0_i32_0 = arith.constant 0 : i32
    %c0_i32_1 = arith.constant 0 : i32
    return %c0_i32, %c0_i32_0 : i32, i32
  }
  func.func @transform_14(%arg0: i32) -> (i32, i32) {
    %c0_i32 = arith.constant 0 : i32
    %c0_i32_0 = arith.constant 0 : i32
    %c0_i32_1 = arith.constant 0 : i32
    return %c0_i32, %c0_i32_0 : i32, i32
  }
  func.func @transform_15(%arg0: i32) -> (i32, i32) {
    %c0_i32 = arith.constant 0 : i32
    %c0_i32_0 = arith.constant 0 : i32
    %c0_i32_1 = arith.constant 0 : i32
    return %c0_i32, %c0_i32_0 : i32, i32
  }
  func.func @transform_16(%arg0: i32) -> (i32, i32) {
    %c0_i32 = arith.constant 0 : i32
    %c0_i32_0 = arith.constant 0 : i32
    %c0_i32_1 = arith.constant 0 : i32
    return %c0_i32, %c0_i32_0 : i32, i32
  }
  func.func @transform_17(%arg0: i32) -> (i32, i32) {
    %c0_i32 = arith.constant 0 : i32
    %c0_i32_0 = arith.constant 0 : i32
    %c0_i32_1 = arith.constant 0 : i32
    return %c0_i32, %c0_i32_0 : i32, i32
  }
  func.func @transform_18(%arg0: i32) -> (i32, i32) {
    %c0_i32 = arith.constant 0 : i32
    %c0_i32_0 = arith.constant 0 : i32
    return %arg0, %c0_i32 : i32, i32
  }
}

module attributes {stable_mosaic.version = 11 : i64} {
  func.func @encoder_kernel(%arg0: i32, %arg1: memref<2x8x128xbf16, #tpu.memory_space<vmem>>, %arg2: memref<2x1x8xf32, #tpu.memory_space<vmem>>, %arg3: memref<128x128xbf16, #tpu.memory_space<vmem>>, %arg4: memref<1x128xf32, #tpu.memory_space<vmem>>, %arg5: memref<128x128xbf16, #tpu.memory_space<vmem>>, %arg6: memref<1x128xf32, #tpu.memory_space<vmem>>, %arg7: memref<128x128xbf16, #tpu.memory_space<vmem>>, %arg8: memref<1x128xf32, #tpu.memory_space<vmem>>, %arg9: memref<128x128xbf16, #tpu.memory_space<vmem>>, %arg10: memref<1x128xf32, #tpu.memory_space<vmem>>, %arg11: memref<1x128xf32, #tpu.memory_space<vmem>>, %arg12: memref<1x128xf32, #tpu.memory_space<vmem>>, %arg13: memref<128x512xbf16, #tpu.memory_space<vmem>>, %arg14: memref<1x512xf32, #tpu.memory_space<vmem>>, %arg15: memref<512x128xbf16, #tpu.memory_space<vmem>>, %arg16: memref<1x128xf32, #tpu.memory_space<vmem>>, %arg17: memref<1x128xf32, #tpu.memory_space<vmem>>, %arg18: memref<1x128xf32, #tpu.memory_space<vmem>>, %arg19: memref<2x128xf32, #tpu.memory_space<vmem>>) attributes {dimension_semantics = [#tpu.dimension_semantics<parallel>], iteration_bounds = array<i64: 1>, scalar_prefetch = 0 : i64, scratch_operands = 0 : i64, tpu.core_type = #tpu.core_type<tc>, window_params = [{transform_indices = @transform_0, window_bounds = array<i64: 2, 8, 128>}, {transform_indices = @transform_1, window_bounds = array<i64: 2, 1, 8>}, {pipeline_mode = #tpu.pipeline_mode<synchronous>, transform_indices = @transform_2, window_bounds = array<i64: 128, 128>}, {pipeline_mode = #tpu.pipeline_mode<synchronous>, transform_indices = @transform_3, window_bounds = array<i64: 1, 128>}, {pipeline_mode = #tpu.pipeline_mode<synchronous>, transform_indices = @transform_4, window_bounds = array<i64: 128, 128>}, {pipeline_mode = #tpu.pipeline_mode<synchronous>, transform_indices = @transform_5, window_bounds = array<i64: 1, 128>}, {pipeline_mode = #tpu.pipeline_mode<synchronous>, transform_indices = @transform_6, window_bounds = array<i64: 128, 128>}, {pipeline_mode = #tpu.pipeline_mode<synchronous>, transform_indices = @transform_7, window_bounds = array<i64: 1, 128>}, {pipeline_mode = #tpu.pipeline_mode<synchronous>, transform_indices = @transform_8, window_bounds = array<i64: 128, 128>}, {pipeline_mode = #tpu.pipeline_mode<synchronous>, transform_indices = @transform_9, window_bounds = array<i64: 1, 128>}, {pipeline_mode = #tpu.pipeline_mode<synchronous>, transform_indices = @transform_10, window_bounds = array<i64: 1, 128>}, {pipeline_mode = #tpu.pipeline_mode<synchronous>, transform_indices = @transform_11, window_bounds = array<i64: 1, 128>}, {pipeline_mode = #tpu.pipeline_mode<synchronous>, transform_indices = @transform_12, window_bounds = array<i64: 128, 512>}, {pipeline_mode = #tpu.pipeline_mode<synchronous>, transform_indices = @transform_13, window_bounds = array<i64: 1, 512>}, {pipeline_mode = #tpu.pipeline_mode<synchronous>, transform_indices = @transform_14, window_bounds = array<i64: 512, 128>}, {pipeline_mode = #tpu.pipeline_mode<synchronous>, transform_indices = @transform_15, window_bounds = array<i64: 1, 128>}, {pipeline_mode = #tpu.pipeline_mode<synchronous>, transform_indices = @transform_16, window_bounds = array<i64: 1, 128>}, {pipeline_mode = #tpu.pipeline_mode<synchronous>, transform_indices = @transform_17, window_bounds = array<i64: 1, 128>}, {transform_indices = @transform_18, window_bounds = array<i64: 2, 128>}]} {
    %c0 = arith.constant 0 : index
    %c0_0 = arith.constant 0 : index
    %c0_1 = arith.constant 0 : index
    %0 = vector.load %arg1[%c0, %c0_0, %c0_1] : memref<2x8x128xbf16, #tpu.memory_space<vmem>>, vector<2x8x128xbf16>
    %1 = vector.shape_cast %0 : vector<2x8x128xbf16> to vector<16x128xbf16>
    %c0_2 = arith.constant 0 : index
    %c0_3 = arith.constant 0 : index
    %2 = vector.load %arg5[%c0_2, %c0_3] : memref<128x128xbf16, #tpu.memory_space<vmem>>, vector<128x128xbf16>
    %cst = arith.constant dense<0.000000e+00> : vector<16x128xf32>
    %3 = tpu.matmul %1, %2, %cst {dimension_numbers = #tpu.dot_dimension_numbers<[1], [0], [0], [1], [0, 0, 1, 1], [], []>} : vector<16x128xbf16>, vector<128x128xbf16>, vector<16x128xf32> -> vector<16x128xf32>
    %c0_4 = arith.constant 0 : index
    %c0_5 = arith.constant 0 : index
    %4 = vector.load %arg6[%c0_4, %c0_5] : memref<1x128xf32, #tpu.memory_space<vmem>>, vector<1x128xf32>
    %5 = vector.broadcast %4 : vector<1x128xf32> to vector<16x128xf32>
    %6 = arith.addf %3, %5 : vector<16x128xf32>
    %7 = vector.shape_cast %6 : vector<16x128xf32> to vector<2x8x128xf32>
    %c0_6 = arith.constant 0 : index
    %c0_7 = arith.constant 0 : index
    %8 = vector.load %arg7[%c0_6, %c0_7] : memref<128x128xbf16, #tpu.memory_space<vmem>>, vector<128x128xbf16>
    %cst_8 = arith.constant dense<0.000000e+00> : vector<16x128xf32>
    %9 = tpu.matmul %1, %8, %cst_8 {dimension_numbers = #tpu.dot_dimension_numbers<[1], [0], [0], [1], [0, 0, 1, 1], [], []>} : vector<16x128xbf16>, vector<128x128xbf16>, vector<16x128xf32> -> vector<16x128xf32>
    %c0_9 = arith.constant 0 : index
    %c0_10 = arith.constant 0 : index
    %10 = vector.load %arg8[%c0_9, %c0_10] : memref<1x128xf32, #tpu.memory_space<vmem>>, vector<1x128xf32>
    %11 = vector.broadcast %10 : vector<1x128xf32> to vector<16x128xf32>
    %12 = arith.addf %9, %11 : vector<16x128xf32>
    %13 = vector.shape_cast %12 : vector<16x128xf32> to vector<2x8x128xf32>
    %14 = vector.extract_strided_slice %0 {offsets = [0, 0, 0], sizes = [2, 1, 128], strides = [1, 1, 1]} : vector<2x8x128xbf16> to vector<2x1x128xbf16>
    %15 = vector.shape_cast %14 : vector<2x1x128xbf16> to vector<2x128xbf16>
    %16 = arith.extf %15 : vector<2x128xbf16> to vector<2x128xf32>
    %c0_11 = arith.constant 0 : index
    %c0_12 = arith.constant 0 : index
    %17 = vector.load %arg3[%c0_11, %c0_12] : memref<128x128xbf16, #tpu.memory_space<vmem>>, vector<128x128xbf16>
    %cst_13 = arith.constant dense<0.000000e+00> : vector<2x128xf32>
    %18 = tpu.matmul %15, %17, %cst_13 {dimension_numbers = #tpu.dot_dimension_numbers<[1], [0], [0], [1], [0, 0, 1, 1], [], []>} : vector<2x128xbf16>, vector<128x128xbf16>, vector<2x128xf32> -> vector<2x128xf32>
    %c0_14 = arith.constant 0 : index
    %c0_15 = arith.constant 0 : index
    %19 = vector.load %arg4[%c0_14, %c0_15] : memref<1x128xf32, #tpu.memory_space<vmem>>, vector<1x128xf32>
    %20 = vector.broadcast %19 : vector<1x128xf32> to vector<2x128xf32>
    %21 = arith.addf %18, %20 : vector<2x128xf32>
    %cst_16 = arith.constant 0.0883883461 : f32
    %22 = vector.broadcast %cst_16 : f32 to vector<2x128xf32>
    %23 = arith.mulf %21, %22 : vector<2x128xf32>
    %c0_17 = arith.constant 0 : index
    %c0_18 = arith.constant 0 : index
    %c0_19 = arith.constant 0 : index
    %24 = vector.load %arg2[%c0_17, %c0_18, %c0_19] : memref<2x1x8xf32, #tpu.memory_space<vmem>>, vector<2x1x8xf32>
    %25 = vector.shape_cast %24 : vector<2x1x8xf32> to vector<2x8xf32>
    %26 = vector.shape_cast %23 : vector<2x128xf32> to vector<2x1x128xf32>
    %27 = vector.broadcast %26 : vector<2x1x128xf32> to vector<2x8x128xf32>
    %28 = arith.mulf %27, %7 : vector<2x8x128xf32>
    %cst_20 = arith.constant dense<0.000000e+00> : vector<2x8xf32>
    %29 = vector.multi_reduction <add>, %28, %cst_20 [2] : vector<2x8x128xf32> to vector<2x8xf32>
    %30 = arith.addf %29, %25 : vector<2x8xf32>
    %cst_21 = arith.constant dense<0xFF800000> : vector<2xf32>
    %31 = vector.multi_reduction <maximumf>, %30, %cst_21 [1] : vector<2x8xf32> to vector<2xf32>
    %32 = vector.shape_cast %31 : vector<2xf32> to vector<2x1xf32>
    %33 = vector.broadcast %32 : vector<2x1xf32> to vector<2x8xf32>
    %34 = arith.subf %30, %33 : vector<2x8xf32>
    %35 = math.exp %34 : vector<2x8xf32>
    %cst_22 = arith.constant dense<0.000000e+00> : vector<2xf32>
    %36 = vector.multi_reduction <add>, %35, %cst_22 [1] : vector<2x8xf32> to vector<2xf32>
    %37 = vector.shape_cast %36 : vector<2xf32> to vector<2x1xf32>
    %38 = vector.shape_cast %35 : vector<2x8xf32> to vector<2x8x1xf32>
    %39 = vector.broadcast %38 : vector<2x8x1xf32> to vector<2x8x128xf32>
    %40 = arith.mulf %39, %13 : vector<2x8x128xf32>
    %cst_23 = arith.constant dense<0.000000e+00> : vector<2x128xf32>
    %41 = vector.multi_reduction <add>, %40, %cst_23 [1] : vector<2x8x128xf32> to vector<2x128xf32>
    %42 = tpu.reciprocal %37 {approx = true} : vector<2x1xf32> -> vector<2x1xf32>
    %43 = vector.broadcast %42 : vector<2x1xf32> to vector<2x128xf32>
    %44 = arith.mulf %41, %43 : vector<2x128xf32>
    %45 = arith.truncf %44 : vector<2x128xf32> to vector<2x128xbf16>
    %c0_24 = arith.constant 0 : index
    %c0_25 = arith.constant 0 : index
    %46 = vector.load %arg9[%c0_24, %c0_25] : memref<128x128xbf16, #tpu.memory_space<vmem>>, vector<128x128xbf16>
    %cst_26 = arith.constant dense<0.000000e+00> : vector<2x128xf32>
    %47 = tpu.matmul %45, %46, %cst_26 {dimension_numbers = #tpu.dot_dimension_numbers<[1], [0], [0], [1], [0, 0, 1, 1], [], []>} : vector<2x128xbf16>, vector<128x128xbf16>, vector<2x128xf32> -> vector<2x128xf32>
    %c0_27 = arith.constant 0 : index
    %c0_28 = arith.constant 0 : index
    %48 = vector.load %arg10[%c0_27, %c0_28] : memref<1x128xf32, #tpu.memory_space<vmem>>, vector<1x128xf32>
    %49 = vector.broadcast %48 : vector<1x128xf32> to vector<2x128xf32>
    %50 = arith.addf %47, %49 : vector<2x128xf32>
    %51 = arith.addf %16, %50 : vector<2x128xf32>
    %c0_29 = arith.constant 0 : index
    %c0_30 = arith.constant 0 : index
    %52 = vector.load %arg11[%c0_29, %c0_30] : memref<1x128xf32, #tpu.memory_space<vmem>>, vector<1x128xf32>
    %c0_31 = arith.constant 0 : index
    %c0_32 = arith.constant 0 : index
    %53 = vector.load %arg12[%c0_31, %c0_32] : memref<1x128xf32, #tpu.memory_space<vmem>>, vector<1x128xf32>
    %cst_33 = arith.constant dense<0.000000e+00> : vector<2xf32>
    %54 = vector.multi_reduction <add>, %51, %cst_33 [1] : vector<2x128xf32> to vector<2xf32>
    %55 = vector.shape_cast %54 : vector<2xf32> to vector<2x1xf32>
    %cst_34 = arith.constant 1.280000e+02 : f32
    %56 = vector.broadcast %cst_34 : f32 to vector<2x1xf32>
    %57 = arith.divf %55, %56 : vector<2x1xf32>
    %58 = vector.broadcast %57 : vector<2x1xf32> to vector<2x128xf32>
    %59 = arith.subf %51, %58 : vector<2x128xf32>
    %60 = arith.mulf %59, %59 : vector<2x128xf32>
    %cst_35 = arith.constant dense<0.000000e+00> : vector<2xf32>
    %61 = vector.multi_reduction <add>, %60, %cst_35 [1] : vector<2x128xf32> to vector<2xf32>
    %62 = vector.shape_cast %61 : vector<2xf32> to vector<2x1xf32>
    %cst_36 = arith.constant 1.280000e+02 : f32
    %63 = vector.broadcast %cst_36 : f32 to vector<2x1xf32>
    %64 = arith.divf %62, %63 : vector<2x1xf32>
    %65 = vector.broadcast %57 : vector<2x1xf32> to vector<2x128xf32>
    %66 = arith.subf %51, %65 : vector<2x128xf32>
    %cst_37 = arith.constant 9.99999974E-6 : f32
    %67 = vector.broadcast %cst_37 : f32 to vector<2x1xf32>
    %68 = arith.addf %64, %67 : vector<2x1xf32>
    %69 = math.rsqrt %68 : vector<2x1xf32>
    %70 = vector.broadcast %69 : vector<2x1xf32> to vector<2x128xf32>
    %71 = arith.mulf %66, %70 : vector<2x128xf32>
    %72 = vector.broadcast %52 : vector<1x128xf32> to vector<2x128xf32>
    %73 = arith.mulf %71, %72 : vector<2x128xf32>
    %74 = vector.broadcast %53 : vector<1x128xf32> to vector<2x128xf32>
    %75 = arith.addf %73, %74 : vector<2x128xf32>
    %76 = arith.truncf %75 : vector<2x128xf32> to vector<2x128xbf16>
    %c0_38 = arith.constant 0 : index
    %c0_39 = arith.constant 0 : index
    %77 = vector.load %arg13[%c0_38, %c0_39] : memref<128x512xbf16, #tpu.memory_space<vmem>>, vector<128x512xbf16>
    %cst_40 = arith.constant dense<0.000000e+00> : vector<2x512xf32>
    %78 = tpu.matmul %76, %77, %cst_40 {dimension_numbers = #tpu.dot_dimension_numbers<[1], [0], [0], [1], [0, 0, 1, 1], [], []>} : vector<2x128xbf16>, vector<128x512xbf16>, vector<2x512xf32> -> vector<2x512xf32>
    %c0_41 = arith.constant 0 : index
    %c0_42 = arith.constant 0 : index
    %79 = vector.load %arg14[%c0_41, %c0_42] : memref<1x512xf32, #tpu.memory_space<vmem>>, vector<1x512xf32>
    %80 = vector.broadcast %79 : vector<1x512xf32> to vector<2x512xf32>
    %81 = arith.addf %78, %80 : vector<2x512xf32>
    %82 = arith.mulf %81, %81 : vector<2x512xf32>
    %83 = arith.mulf %81, %82 : vector<2x512xf32>
    %cst_43 = arith.constant 4.471500e-02 : f32
    %84 = vector.broadcast %cst_43 : f32 to vector<2x512xf32>
    %85 = arith.mulf %84, %83 : vector<2x512xf32>
    %86 = arith.addf %81, %85 : vector<2x512xf32>
    %cst_44 = arith.constant 0.797884583 : f32
    %87 = vector.broadcast %cst_44 : f32 to vector<2x512xf32>
    %88 = arith.mulf %87, %86 : vector<2x512xf32>
    %89 = math.tanh %88 : vector<2x512xf32>
    %cst_45 = arith.constant 1.000000e+00 : f32
    %90 = vector.broadcast %cst_45 : f32 to vector<2x512xf32>
    %91 = arith.addf %90, %89 : vector<2x512xf32>
    %cst_46 = arith.constant 5.000000e-01 : f32
    %92 = vector.broadcast %cst_46 : f32 to vector<2x512xf32>
    %93 = arith.mulf %92, %91 : vector<2x512xf32>
    %94 = arith.mulf %81, %93 : vector<2x512xf32>
    %95 = arith.truncf %94 : vector<2x512xf32> to vector<2x512xbf16>
    %c0_47 = arith.constant 0 : index
    %c0_48 = arith.constant 0 : index
    %96 = vector.load %arg15[%c0_47, %c0_48] : memref<512x128xbf16, #tpu.memory_space<vmem>>, vector<512x128xbf16>
    %cst_49 = arith.constant dense<0.000000e+00> : vector<2x128xf32>
    %97 = tpu.matmul %95, %96, %cst_49 {dimension_numbers = #tpu.dot_dimension_numbers<[1], [0], [0], [1], [0, 0, 1, 1], [], []>} : vector<2x512xbf16>, vector<512x128xbf16>, vector<2x128xf32> -> vector<2x128xf32>
    %c0_50 = arith.constant 0 : index
    %c0_51 = arith.constant 0 : index
    %98 = vector.load %arg16[%c0_50, %c0_51] : memref<1x128xf32, #tpu.memory_space<vmem>>, vector<1x128xf32>
    %99 = vector.broadcast %98 : vector<1x128xf32> to vector<2x128xf32>
    %100 = arith.addf %97, %99 : vector<2x128xf32>
    %101 = arith.addf %75, %100 : vector<2x128xf32>
    %c0_52 = arith.constant 0 : index
    %c0_53 = arith.constant 0 : index
    %102 = vector.load %arg17[%c0_52, %c0_53] : memref<1x128xf32, #tpu.memory_space<vmem>>, vector<1x128xf32>
    %c0_54 = arith.constant 0 : index
    %c0_55 = arith.constant 0 : index
    %103 = vector.load %arg18[%c0_54, %c0_55] : memref<1x128xf32, #tpu.memory_space<vmem>>, vector<1x128xf32>
    %cst_56 = arith.constant dense<0.000000e+00> : vector<2xf32>
    %104 = vector.multi_reduction <add>, %101, %cst_56 [1] : vector<2x128xf32> to vector<2xf32>
    %105 = vector.shape_cast %104 : vector<2xf32> to vector<2x1xf32>
    %cst_57 = arith.constant 1.280000e+02 : f32
    %106 = vector.broadcast %cst_57 : f32 to vector<2x1xf32>
    %107 = arith.divf %105, %106 : vector<2x1xf32>
    %108 = vector.broadcast %107 : vector<2x1xf32> to vector<2x128xf32>
    %109 = arith.subf %101, %108 : vector<2x128xf32>
    %110 = arith.mulf %109, %109 : vector<2x128xf32>
    %cst_58 = arith.constant dense<0.000000e+00> : vector<2xf32>
    %111 = vector.multi_reduction <add>, %110, %cst_58 [1] : vector<2x128xf32> to vector<2xf32>
    %112 = vector.shape_cast %111 : vector<2xf32> to vector<2x1xf32>
    %cst_59 = arith.constant 1.280000e+02 : f32
    %113 = vector.broadcast %cst_59 : f32 to vector<2x1xf32>
    %114 = arith.divf %112, %113 : vector<2x1xf32>
    %115 = vector.broadcast %107 : vector<2x1xf32> to vector<2x128xf32>
    %116 = arith.subf %101, %115 : vector<2x128xf32>
    %cst_60 = arith.constant 9.99999974E-6 : f32
    %117 = vector.broadcast %cst_60 : f32 to vector<2x1xf32>
    %118 = arith.addf %114, %117 : vector<2x1xf32>
    %119 = math.rsqrt %118 : vector<2x1xf32>
    %120 = vector.broadcast %119 : vector<2x1xf32> to vector<2x128xf32>
    %121 = arith.mulf %116, %120 : vector<2x128xf32>
    %122 = vector.broadcast %102 : vector<1x128xf32> to vector<2x128xf32>
    %123 = arith.mulf %121, %122 : vector<2x128xf32>
    %124 = vector.broadcast %103 : vector<1x128xf32> to vector<2x128xf32>
    %125 = arith.addf %123, %124 : vector<2x128xf32>
    %c0_61 = arith.constant 0 : index
    %c0_62 = arith.constant 0 : index
    %126 = vector.load %arg19[%c0_61, %c0_62] : memref<2x128xf32, #tpu.memory_space<vmem>>, vector<2x128xf32>
    tpu.vector_store %arg19[%c0_61, %c0_62], %125 {strides = array<i32>} : memref<2x128xf32, #tpu.memory_space<vmem>>, vector<2x128xf32>,
    return
  }
  func.func @transform_0(%arg0: i32) -> (i32, i32, i32) {
    %c0_i32 = arith.constant 0 : i32
    %c0_i32_0 = arith.constant 0 : i32
    %c0_i32_1 = arith.constant 0 : i32
    return %arg0, %c0_i32, %c0_i32_0 : i32, i32, i32
  }
  func.func @transform_1(%arg0: i32) -> (i32, i32, i32) {
    %c0_i32 = arith.constant 0 : i32
    %c0_i32_0 = arith.constant 0 : i32
    %c0_i32_1 = arith.constant 0 : i32
    return %arg0, %c0_i32, %c0_i32_0 : i32, i32, i32
  }
  func.func @transform_2(%arg0: i32) -> (i32, i32) {
    %c0_i32 = arith.constant 0 : i32
    %c0_i32_0 = arith.constant 0 : i32
    %c0_i32_1 = arith.constant 0 : i32
    return %c0_i32, %c0_i32_0 : i32, i32
  }
  func.func @transform_3(%arg0: i32) -> (i32, i32) {
    %c0_i32 = arith.constant 0 : i32
    %c0_i32_0 = arith.constant 0 : i32
    %c0_i32_1 = arith.constant 0 : i32
    return %c0_i32, %c0_i32_0 : i32, i32
  }
  func.func @transform_4(%arg0: i32) -> (i32, i32) {
    %c0_i32 = arith.constant 0 : i32
    %c0_i32_0 = arith.constant 0 : i32
    %c0_i32_1 = arith.constant 0 : i32
    return %c0_i32, %c0_i32_0 : i32, i32
  }
  func.func @transform_5(%arg0: i32) -> (i32, i32) {
    %c0_i32 = arith.constant 0 : i32
    %c0_i32_0 = arith.constant 0 : i32
    %c0_i32_1 = arith.constant 0 : i32
    return %c0_i32, %c0_i32_0 : i32, i32
  }
  func.func @transform_6(%arg0: i32) -> (i32, i32) {
    %c0_i32 = arith.constant 0 : i32
    %c0_i32_0 = arith.constant 0 : i32
    %c0_i32_1 = arith.constant 0 : i32
    return %c0_i32, %c0_i32_0 : i32, i32
  }
  func.func @transform_7(%arg0: i32) -> (i32, i32) {
    %c0_i32 = arith.constant 0 : i32
    %c0_i32_0 = arith.constant 0 : i32
    %c0_i32_1 = arith.constant 0 : i32
    return %c0_i32, %c0_i32_0 : i32, i32
  }
  func.func @transform_8(%arg0: i32) -> (i32, i32) {
    %c0_i32 = arith.constant 0 : i32
    %c0_i32_0 = arith.constant 0 : i32
    %c0_i32_1 = arith.constant 0 : i32
    return %c0_i32, %c0_i32_0 : i32, i32
  }
  func.func @transform_9(%arg0: i32) -> (i32, i32) {
    %c0_i32 = arith.constant 0 : i32
    %c0_i32_0 = arith.constant 0 : i32
    %c0_i32_1 = arith.constant 0 : i32
    return %c0_i32, %c0_i32_0 : i32, i32
  }
  func.func @transform_10(%arg0: i32) -> (i32, i32) {
    %c0_i32 = arith.constant 0 : i32
    %c0_i32_0 = arith.constant 0 : i32
    %c0_i32_1 = arith.constant 0 : i32
    return %c0_i32, %c0_i32_0 : i32, i32
  }
  func.func @transform_11(%arg0: i32) -> (i32, i32) {
    %c0_i32 = arith.constant 0 : i32
    %c0_i32_0 = arith.constant 0 : i32
    %c0_i32_1 = arith.constant 0 : i32
    return %c0_i32, %c0_i32_0 : i32, i32
  }
  func.func @transform_12(%arg0: i32) -> (i32, i32) {
    %c0_i32 = arith.constant 0 : i32
    %c0_i32_0 = arith.constant 0 : i32
    %c0_i32_1 = arith.constant 0 : i32
    return %c0_i32, %c0_i32_0 : i32, i32
  }
  func.func @transform_13(%arg0: i32) -> (i32, i32) {
    %c0_i32 = arith.constant 0 : i32
    %c0_i32_0 = arith.constant 0 : i32
    %c0_i32_1 = arith.constant 0 : i32
    return %c0_i32, %c0_i32_0 : i32, i32
  }
  func.func @transform_14(%arg0: i32) -> (i32, i32) {
    %c0_i32 = arith.constant 0 : i32
    %c0_i32_0 = arith.constant 0 : i32
    %c0_i32_1 = arith.constant 0 : i32
    return %c0_i32, %c0_i32_0 : i32, i32
  }
  func.func @transform_15(%arg0: i32) -> (i32, i32) {
    %c0_i32 = arith.constant 0 : i32
    %c0_i32_0 = arith.constant 0 : i32
    %c0_i32_1 = arith.constant 0 : i32
    return %c0_i32, %c0_i32_0 : i32, i32
  }
  func.func @transform_16(%arg0: i32) -> (i32, i32) {
    %c0_i32 = arith.constant 0 : i32
    %c0_i32_0 = arith.constant 0 : i32
    %c0_i32_1 = arith.constant 0 : i32
    return %c0_i32, %c0_i32_0 : i32, i32
  }
  func.func @transform_17(%arg0: i32) -> (i32, i32) {
    %c0_i32 = arith.constant 0 : i32
    %c0_i32_0 = arith.constant 0 : i32
    %c0_i32_1 = arith.constant 0 : i32
    return %c0_i32, %c0_i32_0 : i32, i32
  }
  func.func @transform_18(%arg0: i32) -> (i32, i32) {
    %c0_i32 = arith.constant 0 : i32
    %c0_i32_0 = arith.constant 0 : i32
    return %arg0, %c0_i32 : i32, i32
  }
}

</mosaic_0001>

<bundles_post_ra>
// kernel: tpu_custom_call.1
= control target key start
LH: loop header
LB: loop body
LE: loop exit
PB: predicated region body
PF: predicated region fallthrough
CT: control target
= control target key end

     0   :  { %s2600_s0 = inlined_call_operand.hbm [shape: bf16[2,8,128], index: 0, kind: input, shape index: {}]   ;;  %s2601_s1 = inlined_call_operand.vmem [shape: f32[2,1,8], index: 1, kind: input, shape index: {}]   ;;  %s2602_s2 = inlined_call_operand.hbm [shape: bf16[128,128], index: 2, kind: input, shape index: {}]   ;;  %s2603_s3 = inlined_call_operand.vmem [shape: f32[1,128], index: 3, kind: input, shape index: {}]   ;;  %s2604_s4 = inlined_call_operand.hbm [shape: bf16[128,128], index: 4, kind: input, shape index: {}]   ;;  %s2605_s5 = inlined_call_operand.vmem [shape: f32[1,128], index: 5, kind: input, shape index: {}]   ;;  %s2606_s6 = inlined_call_operand.hbm [shape: bf16[128,128], index: 6, kind: input, shape index: {}]   ;;  %s2607_s7 = inlined_call_operand.vmem [shape: f32[1,128], index: 7, kind: input, shape index: {}]   ;;  %s2608_s8 = inlined_call_operand.hbm [shape: bf16[128,128], index: 8, kind: input, shape index: {}]   ;;  %s2609_s9 = inlined_call_operand.vmem [shape: f32[1,128], index: 9, kind: input, shape index: {}]   ;;  %s2610_s10 = inlined_call_operand.vmem [shape: f32[1,128], index: 10, kind: input, shape index: {}]   ;;  %s2611_s11 = inlined_call_operand.vmem [shape: f32[1,128], index: 11, kind: input, shape index: {}]   ;;  %s2612_s12 = inlined_call_operand.hbm [shape: bf16[128,512], index: 12, kind: input, shape index: {}]   ;;  %s2613_s13 = inlined_call_operand.vmem [shape: f32[1,512], index: 13, kind: input, shape index: {}]   ;;  %s2614_s14 = inlined_call_operand.hbm [shape: bf16[512,128], index: 14, kind: input, shape index: {}]   ;;  %s2615_s15 = inlined_call_operand.vmem [shape: f32[1,128], index: 15, kind: input, shape index: {}]   ;;  %s2616_s16 = inlined_call_operand.vmem [shape: f32[1,128], index: 16, kind: input, shape index: {}]   ;;  %s2617_s17 = inlined_call_operand.vmem [shape: f32[1,128], index: 17, kind: input, shape index: {}]   ;;  %s2618_s18 = inlined_call_operand.hbm [shape: f32[2,128], index: 18, kind: output, shape index: {}]  }
   0x1   :  { %2627 = sst [smem:[#allocation20_spill]] %s2600_s0 }
   0x2   :  { %2628 = sst [smem:[#allocation21_spill]] %s2601_s1 }
   0x3   :  { %2629 = sst [smem:[#allocation22_spill]] %s2602_s2 }
   0x4   :  { %2630 = sst [smem:[#allocation23_spill]] %s2618_s18 }
   0x5   :  { %23 = vsyncpa [#allocation3], 0 }
   0x6   :  { %24 = vsyncpa [#allocation6], 0 }
   0x7   :  { %25 = vsyncpa [#allocation9], 0 }
   0x8   :  { %26 = vsyncpa [#allocation12], 0 }
   0x9   :  { %27 = vsyncpa [#allocation4], 0  ;;  %s2216_s27 = smov [#allocation5]   ;;  %s2217_s29 = smov [#allocation8]  }
   0xa   :  { %s47_s28 = sshll.u32 %s2216_s27, 4  ;;  %s75_s30 = sshll.u32 %s2217_s29, 4  ;;  %s48_s28 = int_to_ptr.vmem [resolvable:$true] %s47_s28  ;;  %s2327_s30 = int_to_ptr.vmem [resolvable:$true] %s75_s30 }
   0xb   :  { %s2631_s1 = sld [smem:[#allocation22_spill]] }
  0x11   :  { %s2030_s20 = scalar_lea.hbm %s2631_s1, 1024 }
  0x12   :  { %p2031_p0 = scmp.ne.s32.totalorder %s2631_s1, %s2030_s20  ;;  %p2034_p1 = scmp.lt.u32.totalorder %s2030_s20, %s2631_s1 }
  0x14   :  { %p2036_p2 = pnand %p2034_p1, %p2031_p0 }
  0x16   :  { %2039 = shalt.err (!%p2036_p2)
}
  0x17   :  { %s2040_s24 = scalar_lea.vmem %s48_s28, 1024  ;;  %p2045_p4 = scmp.lt.s32.totalorder %s48_s28, %s48_s28 }
  0x18   :  { %p2041_p3 = scmp.ne.s32.totalorder %s48_s28, %s2040_s24  ;;  %p2046_p5 = scmp.lt.s32.totalorder %s2040_s24, %s2040_s24 }
  0x1a   :  { %p2047_p6 = por %p2046_p5, %p2045_p4 }
  0x1c   :  { %p2048_p7 = pnand %p2047_p6, %p2041_p3 }
  0x1e   :  { %2051 = shalt.err (!%p2048_p7)
}
  0x1f   :  { %s2622_s25 = smov 64   ;;  %s2624_s26 = smov 4  }
  0x20   :  { %53 = dma.hbm_to_vmem [thread:$0]  %s2631_s1, 1024, %s48_s28, [#allocation6], %s2622_s25, %s2622_s25, %s2624_s26  }
  0x21   :  { %s2052_s20 = scalar_lea.hbm %s2606_s6, 1024 }
  0x22   :  { %p2053_p8 = scmp.ne.s32.totalorder %s2606_s6, %s2052_s20  ;;  %p2056_p9 = scmp.lt.u32.totalorder %s2052_s20, %s2606_s6 }
  0x24   :  { %p2058_p10 = pnand %p2056_p9, %p2053_p8 }
  0x26   :  { %2061 = shalt.err (!%p2058_p10)
}
  0x27   :  { %s2062_s24 = scalar_lea.vmem %s2327_s30, 1024  ;;  %p2067_p12 = scmp.lt.s32.totalorder %s2327_s30, %s2327_s30 }
  0x28   :  { %p2063_p11 = scmp.ne.s32.totalorder %s2327_s30, %s2062_s24  ;;  %p2068_p13 = scmp.lt.s32.totalorder %s2062_s24, %s2062_s24 }
  0x2a   :  { %p2069_p0 = por %p2068_p13, %p2067_p12 }
  0x2c   :  { %p2070_p1 = pnand %p2069_p0, %p2063_p11 }
  0x2e   :  { %2073 = shalt.err (!%p2070_p1)
}
  0x2f   :  { %81 = dma.hbm_to_vmem [thread:$0]  %s2606_s6, 1024, %s2327_s30, [#allocation9], %s2622_s25, %s2622_s25, %s2624_s26  }
  0x30   :  { %s2220_s27 = smov [#allocation11]   ;;  %s2074_s20 = scalar_lea.hbm %s2612_s12, 4096 }
  0x31   :  { %s107_s29 = sshll.u32 %s2220_s27, 4  ;;  %p2075_p2 = scmp.ne.s32.totalorder %s2612_s12, %s2074_s20  ;;  %s108_s29 = int_to_ptr.vmem [resolvable:$true] %s107_s29 }
  0x32   :  { %p2078_p3 = scmp.lt.u32.totalorder %s2074_s20, %s2612_s12 }
  0x34   :  { %p2080_p4 = pnand %p2078_p3, %p2075_p2 }
  0x36   :  { %2083 = shalt.err (!%p2080_p4)
}
  0x37   :  { %s2084_s24 = scalar_lea.vmem %s108_s29, 4096  ;;  %p2089_p6 = scmp.lt.s32.totalorder %s108_s29, %s108_s29 }
  0x38   :  { %p2085_p5 = scmp.ne.s32.totalorder %s108_s29, %s2084_s24  ;;  %p2090_p7 = scmp.lt.s32.totalorder %s2084_s24, %s2084_s24 }
  0x3a   :  { %p2091_p8 = por %p2090_p7, %p2089_p6 }
  0x3c   :  { %p2092_p9 = pnand %p2091_p8, %p2085_p5 }
  0x3e   :  { %2095 = shalt.err (!%p2092_p9)
}
  0x3f   :  { %s2221_s6 = smov 256   ;;  %s2222_s30 = smov 16  }
  0x40   :  { %113 = dma.hbm_to_vmem [thread:$0]  %s2612_s12, 4096, %s108_s29, [#allocation12], %s2221_s6, %s2221_s6, %s2222_s30  }
  0x41   :  { %s2223_s27 = smov [#allocation2]   ;;  %s2224_s19 = smov [#allocation7]  }
  0x42   :  { %s33_s0 = sshll.u32 %s2223_s27, 4  ;;  %s61_s20 = sshll.u32 %s2224_s19, 4  ;;  %s34_s0 = int_to_ptr.vmem [resolvable:$true] %s33_s0  ;;  %s62_s20 = int_to_ptr.vmem [resolvable:$true] %s61_s20 }
  0x43   :  { %s2632_s2 = sld [smem:[#allocation20_spill]] }
  0x49   :  { %s2096_s23 = scalar_lea.hbm %s2632_s2, 128 }
  0x4a   :  { %p2097_p10 = scmp.ne.s32.totalorder %s2632_s2, %s2096_s23  ;;  %p2100_p11 = scmp.lt.u32.totalorder %s2096_s23, %s2632_s2 }
  0x4c   :  { %p2102_p12 = pnand %p2100_p11, %p2097_p10 }
  0x4e   :  { %2105 = shalt.err (!%p2102_p12)
}
  0x4f   :  { %s2106_s12 = scalar_lea.vmem %s34_s0, 128  ;;  %p2111_p0 = scmp.lt.s32.totalorder %s34_s0, %s34_s0 }
  0x50   :  { %p2107_p13 = scmp.ne.s32.totalorder %s34_s0, %s2106_s12  ;;  %p2112_p1 = scmp.lt.s32.totalorder %s2106_s12, %s2106_s12 }
  0x52   :  { %p2113_p2 = por %p2112_p1, %p2111_p0 }
  0x54   :  { %p2114_p3 = pnand %p2113_p2, %p2107_p13 }
  0x56   :  { %2117 = shalt.err (!%p2114_p3)
}
  0x57   :  { %s2633_s29 = smov 4   ;;  %s2634_s6 = smov 64  }
  0x58   :  { %39 = dma.hbm_to_vmem [thread:$0]  %s2632_s2, 128, %s34_s0, [#allocation3], %s2634_s6, %s2634_s6, %s2633_s29  }
  0x59   :  { %s2118_s26 = scalar_lea.hbm %s2604_s4, 1024 }
  0x5a   :  { %p2119_p4 = scmp.ne.s32.totalorder %s2604_s4, %s2118_s26  ;;  %p2122_p5 = scmp.lt.u32.totalorder %s2118_s26, %s2604_s4 }
  0x5c   :  { %p2124_p6 = pnand %p2122_p5, %p2119_p4 }
  0x5e   :  { %2127 = shalt.err (!%p2124_p6)
}
  0x5f   :  { %s2128_s22 = scalar_lea.vmem %s62_s20, 1024  ;;  %p2133_p8 = scmp.lt.s32.totalorder %s62_s20, %s62_s20 }
  0x60   :  { %p2129_p7 = scmp.ne.s32.totalorder %s62_s20, %s2128_s22  ;;  %p2134_p9 = scmp.lt.s32.totalorder %s2128_s22, %s2128_s22 }
  0x62   :  { %p2135_p10 = por %p2134_p9, %p2133_p8 }
  0x64   :  { %p2136_p11 = pnand %p2135_p10, %p2129_p7 }
  0x66   :  { %2139 = shalt.err (!%p2136_p11)
}
  0x67   :  { %67 = dma.hbm_to_vmem [thread:$0]  %s2604_s4, 1024, %s62_s20, [#allocation6], %s2634_s6, %s2634_s6, %s2633_s29  }
  0x68   :  { %s2225_s23 = smov [#allocation10]   ;;  %s2226_s12 = smov [#allocation13]  }
  0x69   :  { %s89_s24 = sshll.u32 %s2225_s23, 4  ;;  %s121_s30 = sshll.u32 %s2226_s12, 4  ;;  %s90_s24 = int_to_ptr.vmem [resolvable:$true] %s89_s24  ;;  %s122_s30 = int_to_ptr.vmem [resolvable:$true] %s121_s30 }
  0x6a   :  { %s2140_s18 = scalar_lea.hbm %s2608_s8, 1024 }
  0x6b   :  { %p2141_p12 = scmp.ne.s32.totalorder %s2608_s8, %s2140_s18  ;;  %p2144_p13 = scmp.lt.u32.totalorder %s2140_s18, %s2608_s8 }
  0x6d   :  { %p2146_p0 = pnand %p2144_p13, %p2141_p12 }
  0x6f   :  { %2149 = shalt.err (!%p2146_p0)
}
  0x70   :  { %s2150_s4 = scalar_lea.vmem %s90_s24, 1024  ;;  %p2155_p2 = scmp.lt.s32.totalorder %s90_s24, %s90_s24 }
  0x71   :  { %p2151_p1 = scmp.ne.s32.totalorder %s90_s24, %s2150_s4  ;;  %p2156_p3 = scmp.lt.s32.totalorder %s2150_s4, %s2150_s4 }
  0x73   :  { %p2157_p4 = por %p2156_p3, %p2155_p2 }
  0x75   :  { %p2158_p5 = pnand %p2157_p4, %p2151_p1 }
  0x77   :  { %2161 = shalt.err (!%p2158_p5)
}
  0x78   :  { %95 = dma.hbm_to_vmem [thread:$0]  %s2608_s8, 1024, %s90_s24, [#allocation9], %s2634_s6, %s2634_s6, %s2633_s29  }
  0x79   :  { %s2162_s2 = scalar_lea.hbm %s2614_s14, 4096 }
  0x7a   :  { %p2163_p6 = scmp.ne.s32.totalorder %s2614_s14, %s2162_s2  ;;  %p2166_p7 = scmp.lt.u32.totalorder %s2162_s2, %s2614_s14 }
  0x7c   :  { %p2168_p8 = pnand %p2166_p7, %p2163_p6 }
  0x7e   :  { %2171 = shalt.err (!%p2168_p8)
}
  0x7f   :  { %s2172_s18 = scalar_lea.vmem %s122_s30, 4096  ;;  %p2177_p10 = scmp.lt.s32.totalorder %s122_s30, %s122_s30 }
  0x80   :  { %p2173_p9 = scmp.ne.s32.totalorder %s122_s30, %s2172_s18  ;;  %p2178_p11 = scmp.lt.s32.totalorder %s2172_s18, %s2172_s18 }
  0x82   :  { %p2179_p12 = por %p2178_p11, %p2177_p10 }
  0x84   :  { %p2180_p13 = pnand %p2179_p12, %p2173_p9 }
  0x86   :  { %2183 = shalt.err (!%p2180_p13)
}
  0x87   :  { %127 = dma.hbm_to_vmem [thread:$0]  %s2614_s14, 4096, %s122_s30, [#allocation12], %s2634_s6, %s2634_s6, %s2633_s29  }
  0x88   :  { %2206 = dma.done.wait [#allocation3], 128  }
  0x89   :  { %2207 = vsyncadd [#allocation3], 4294967168 }
  0x8a   :  { %2208 = dma.done.wait [#allocation6], 2048  }
  0x8b   :  { %2209 = vsyncadd [#allocation6], 4294965248 }
  0x8c   :  { %2210 = dma.done.wait [#allocation9], 2048  }
  0x8d   :  { %2211 = vsyncadd [#allocation9], 4294965248 }
  0x8e   :  { %2212 = dma.done.wait [#allocation12], 8192  }
  0x8f   :  { %2213 = vsyncadd [#allocation12], 4294959104  ;;  %v2227_v0 = vmov 0.0   ;;  %vm2228_vm0 = vmmov 0   ;;  %v1897_v1 = vld [vmem:[#allocation7] sm:$0xff]   ;;  %v1898_v2 = vld [vmem:[#allocation7 + $0x8] sm:$0xff]   ;;  %v517_v35 = vlaneseq }
  0x90   :  { %1799 = vmatprep.subr.bf16.mxu0 %v2227_v0  ;;  %1815 = vmatprep.mubr.msk.bf16.mxu0 %vm2228_vm0, %v2227_v0  ;;  %v1899_v3 = vld [vmem:[#allocation7 + $0x10] sm:$0xff]   ;;  %v1900_v4 = vld [vmem:[#allocation7 + $0x18] sm:$0xff]   ;;  %v1901_v5 = vld [vmem:[#allocation7 + $0x20] sm:$0xff]   ;;  %vm418_vm1 = vcmask 1041409   ;;  %s2635_s6 = sld [smem:[#allocation21_spill]]  ;;  %v2230_v58 = vmov 0  }
  0x91   :  { %1819 = vmatprep.subr.bf16.mxu1 %v2227_v0  ;;  %1835 = vmatprep.mubr.msk.bf16.mxu1 %vm2228_vm0, %v2227_v0  ;;  %v1902_v6 = vld [vmem:[#allocation7 + $0x28] sm:$0xff]   ;;  %v1903_v7 = vld [vmem:[#allocation7 + $0x30] sm:$0xff]   ;;  %v1904_v8 = vld [vmem:[#allocation7 + $0x38] sm:$0xff]   ;;  %v2229_v33 = vmov 1966171168   ;;  %v2480_v37 = vshrl.u32 %v517_v35, 7 }
  0x92   :  { %1800 = vmatpush3.bf16.msra.mxu0 %v1897_v1  ;;  %v2448_v9 = vld [vmem:[#allocation2] sm:$0xf]  ;;  %v2450_v10 = vld [vmem:[#allocation2 + $0x4] sm:$0xf]  ;;  %v1908_v11 = vld [vmem:[#allocation5] sm:$0xff]   ;;  %v515_v34 = vunpack.c.l.s4 %v2229_v33  ;;  %1895 = vset.pattern.permute.xlu0 %v2230_v58  ;;  %vm592_vm2 = vcmask 58368  }
  0x93   :  { %1801 = vmatprep.subr.bf16.mxu0 %v2227_v0  ;;  %v2455_v12 = vcombine.low %v2448_v9, %v2450_v10  ;;  %v1630_v13 = vcombine.low %v2450_v10, %v2450_v10  ;;  %v1909_v14 = vld [vmem:[#allocation5 + $0x8] sm:$0xff]   ;;  %v1910_v16 = vld [vmem:[#allocation5 + $0x10] sm:$0xff]   ;;  %v1911_v18 = vld [vmem:[#allocation5 + $0x18] sm:$0xff]   ;;  %v1629_v21 = vcombine.low %v2448_v9, %v2448_v9  ;;  %v2487_v47 = vsub.s32 0, %v2480_v37  ;;  %1896 = vset.pattern.permute.xlu1 %v2230_v58  ;;  %s2231_s25 = smov [#allocation14]  }
  0x94   :  { %v1912_v19 = vld [vmem:[#allocation5 + $0x20] sm:$0xff]   ;;  %v1913_v20 = vld [vmem:[#allocation5 + $0x28] sm:$0xff]   ;;  %v1914_v22 = vld [vmem:[#allocation5 + $0x30] sm:$0xff]   ;;  %v516_v36 = vunpack.c.0.s8 %v515_v34  ;;  %vm791_vm3 = vcmask 1041408   ;;  %s1597_s18 = sshll.u32 %s2231_s25, 4  ;;  %s1598_s18 = int_to_ptr.vmem [resolvable:$true] %s1597_s18 }
  0x95   :  { %v416_v15 = vunpack.c.l.b16 %v1630_v13  ;;  %v415_v23 = vunpack.c.l.b16 %v1629_v21  ;;  %v1915_v24 = vld [vmem:[#allocation5 + $0x38] sm:$0xff]   ;;  %v581_v13 = vand.u32 127, %v517_v35  ;;  %v1924_v34 = vld [vmem:[#allocation10] sm:$0xff]   ;;  %v1925_v35 = vld [vmem:[#allocation10 + $0x8] sm:$0xff]   ;;  %s2184_s8 = scalar_lea.vmem %s1598_s18, 32  ;;  %p2189_p1 = scmp.lt.s32.totalorder %s1598_s18, %s1598_s18 }
  0x96   :  { %1802 = vmatpush3.bf16.msra.mxu0 %v1898_v2  ;;  %v1639_v27 = vld [vmem:[%s2635_s6] ss:$0 sm:$0xff]  ;;  %v1640_v28 = vld [vmem:[%s2635_s6 + $0x1] ss:$0 sm:$0xff]  ;;  %v519_v41 = vsub.s32 %v516_v36, %v2480_v37  ;;  %v1916_v2 = vld [vmem:[#allocation8] sm:$0xff]   ;;  %p2185_p0 = scmp.ne.s32.totalorder %s1598_s18, %s2184_s8  ;;  %p2190_p2 = scmp.lt.s32.totalorder %s2184_s8, %s2184_s8 }
  0x97   :  { %1803 = vmatprep.subr.bf16.mxu0 %v2227_v0  ;;  %v417_v17 = vrot.slane %v416_v15, 7  ;;  %563 = vbcast.lane.b32.xlu1 %v1639_v27, 256  ;;  %v1628_v38 = vld [vmem:[%s2603_s3] ss:$0 sm:$0xff] }
  0x98   :  { %v1609_v48 = vld [vmem:[%s2605_s5] ss:$0 sm:$0xff]  ;;  %1820 = vmatpush3.bf16.msra.mxu1 %v1916_v2  ;;  %p2191_p3 = por %p2190_p2, %p2189_p1 }
  0x99   :  { %v419_v25 = vsel %vm418_vm1, %v417_v17, %v415_v23  ;;  %1821 = vmatprep.subr.bf16.mxu1 %v2227_v0 }
  0x9a   :  { %1804 = vmatpush3.bf16.msra.mxu0 %v1899_v3  ;;  %v420_v26 = vpack.c.b16 %v419_v25, %v419_v25  ;;  %v1917_v3 = vld [vmem:[#allocation8 + $0x8] sm:$0xff]   ;;  %p2192_p4 = pnand %p2191_p3, %p2185_p0 }
  0x9b   :  { %1805 = vmatprep.subr.bf16.mxu0 %v2227_v0  ;;  %566 = vbcast.lane.b32.xlu1 %v1640_v28, 256 }
  0x9c   :  { %1822 = vmatpush3.bf16.msra.mxu1 %v1917_v3 }
  0x9d   :  { %1823 = vmatprep.subr.bf16.mxu1 %v2227_v0 }
  0x9e   :  { %1806 = vmatpush3.bf16.msra.mxu0 %v1900_v4  ;;  %v1918_v4 = vld [vmem:[#allocation8 + $0x10] sm:$0xff]  }
  0x9f   :  { %1807 = vmatprep.subr.bf16.mxu0 %v2227_v0 }
  0xa0   :  { %1824 = vmatpush3.bf16.msra.mxu1 %v1918_v4 }
  0xa1   :  { %1825 = vmatprep.subr.bf16.mxu1 %v2227_v0 }
  0xa2   :  { %1808 = vmatpush3.bf16.msra.mxu0 %v1901_v5  ;;  %v1919_v5 = vld [vmem:[#allocation8 + $0x18] sm:$0xff]  }
  0xa3   :  { %1809 = vmatprep.subr.bf16.mxu0 %v2227_v0 }
  0xa4   :  { %1826 = vmatpush3.bf16.msra.mxu1 %v1919_v5 }
  0xa5   :  { %1827 = vmatprep.subr.bf16.mxu1 %v2227_v0 }
  0xa6   :  { %1810 = vmatpush3.bf16.msra.mxu0 %v1902_v6  ;;  %v1920_v6 = vld [vmem:[#allocation8 + $0x20] sm:$0xff]  }
  0xa7   :  { %1811 = vmatprep.subr.bf16.mxu0 %v2227_v0 }
  0xa8   :  { %1828 = vmatpush3.bf16.msra.mxu1 %v1920_v6 }
  0xa9   :  { %1829 = vmatprep.subr.bf16.mxu1 %v2227_v0 }
  0xaa   :  { %1812 = vmatpush3.bf16.msra.mxu0 %v1903_v7  ;;  %v1921_v7 = vld [vmem:[#allocation8 + $0x28] sm:$0xff]  }
  0xab   :  { %1813 = vmatprep.subr.bf16.mxu0 %v2227_v0 }
  0xac   :  { %1830 = vmatpush3.bf16.msra.mxu1 %v1921_v7 }
  0xad   :  { %1831 = vmatprep.subr.bf16.mxu1 %v2227_v0 }
  0xae   :  { %1814 = vmatpush3.bf16.msra.mxu0 %v1904_v8  ;;  %v1922_v8 = vld [vmem:[#allocation8 + $0x30] sm:$0xff]  }
  0xaf   :  { %1839 = vmatprep.subr.bf16.mxu0 %v2227_v0 }
  0xb0   :  { %1832 = vmatpush3.bf16.msra.mxu1 %v1922_v8 }
  0xb1   :  { %1816 = vmatmul.mubr.bf16.vlgmr.msra.gmra.mrb[0].mxu0 %v2455_v12  ;;  %1833 = vmatprep.subr.bf16.mxu1 %v2227_v0 }
  0xb2   :  { %1840 = vmatpush3.bf16.msra.mxu0 %v1908_v11  ;;  %1855 = vmatprep.mubr.msk.bf16.mxu0 %vm2228_vm0, %v2227_v0  ;;  %v1923_v11 = vld [vmem:[#allocation8 + $0x38] sm:$0xff]  }
  0xb3   :  { %1841 = vmatprep.subr.bf16.mxu0 %v2227_v0 }
  0xb4   :  { %1834 = vmatpush3.bf16.msra.mxu1 %v1923_v11 }
  0xb5   :  { %1859 = vmatprep.subr.bf16.mxu1 %v2227_v0 }
  0xb6   :  { %1842 = vmatpush3.bf16.msra.mxu0 %v1909_v14  ;;  %v584_v14 = vsub.s32 %v581_v13, %v2480_v37 }
  0xb7   :  { %1843 = vmatprep.subr.bf16.mxu0 %v2227_v0  ;;  %1836 = vmatmul.mubr.bf16.vlgmr.msra.gmra.mrb[0].mxu1 %v2455_v12 }
  0xb8   :  { %1875 = vmatprep.mubr.msk.bf16.mxu1 %vm2228_vm0, %v2227_v0  ;;  %1860 = vmatpush3.bf16.msra.mxu1 %v1924_v34 }
  0xb9   :  { %1861 = vmatprep.subr.bf16.mxu1 %v2227_v0 }
  0xba   :  { %1844 = vmatpush3.bf16.msra.mxu0 %v1910_v16 }
  0xbb   :  { %1845 = vmatprep.subr.bf16.mxu0 %v2227_v0 }
  0xbc   :  { %1862 = vmatpush3.bf16.msra.mxu1 %v1925_v35 }
  0xbd   :  { %1863 = vmatprep.subr.bf16.mxu1 %v2227_v0 }
  0xbe   :  { %1846 = vmatpush3.bf16.msra.mxu0 %v1911_v18 }
  0xbf   :  { %1847 = vmatprep.subr.bf16.mxu0 %v2227_v0 }
  0xc2   :  { %1848 = vmatpush3.bf16.msra.mxu0 %v1912_v19 }
  0xc3   :  { %1849 = vmatprep.subr.bf16.mxu0 %v2227_v0 }
  0xc6   :  { %1850 = vmatpush3.bf16.msra.mxu0 %v1913_v20 }
  0xc7   :  { %1851 = vmatprep.subr.bf16.mxu0 %v2227_v0 }
  0xca   :  { %1852 = vmatpush3.bf16.msra.mxu0 %v1914_v22 }
  0xcb   :  { %1853 = vmatprep.subr.bf16.mxu0 %v2227_v0 }
  0xce   :  { %1854 = vmatpush3.bf16.msra.mxu0 %v1915_v24  ;;  %v603_v24 = vsub.s32 1, %v2480_v37 }
  0xd1   :  { %1856 = vmatmul.mubr.bf16.vlgmr.msra.gmra.mrb[4].mxu0 %v420_v26 }
  0xd2   :  { %1094 = vmatprep.mubr.bf16.mxu0 %v2230_v58 }
 0x109   :  { %v564_v59 = vpop.permute.xlu1 %563 }
 0x10d   :  { %v567_v62 = vpop.permute.xlu1 %566 }
 0x184   :  { %v269_v29 = vpop.f32.mrb[0].mxu0 }
 0x185   :  { %v1817_v30 = vpop.f32.mrb[1].mxu0  ;;  %v270_v51 = vadd.f32 %v1609_v48, %v269_v29 }
 0x186   :  { %v272_v31 = vpop.f32.mrb[2].mxu0 }
 0x187   :  { %v1818_v32 = vpop.f32.mrb[3].mxu0  ;;  %v273_v54 = vadd.f32 %v1609_v48, %v272_v31  ;;  %v1930_v48 = vld [vmem:[#allocation10 + $0x30] sm:$0xff]  }
 0x18a   :  { %v381_v21 = vpop.f32.mrb[0].mxu1 }
 0x18b   :  { %v1837_v22 = vpop.f32.mrb[1].mxu1 }
 0x18c   :  { %v384_v12 = vpop.f32.mrb[2].mxu1 }
 0x18d   :  { %v1838_v23 = vpop.f32.mrb[3].mxu1 }
 0x1a4   :  { %v504_v39 = vpop.f32.mrb[4].mxu0 }
 0x1a5   :  { %v505_v40 = vadd.f32 %v1628_v38, %v504_v39  ;;  %v1857_v42 = vpop.f32.mrb[5].mxu0 }
 0x1a6   :  { %v507_v43 = vpop.f32.mrb[6].mxu0 }
 0x1a7   :  { %v510_v44 = vmul.f32 0.088388346, %v505_v40  ;;  %v1858_v45 = vpop.f32.mrb[7].mxu0  ;;  %v1926_v43 = vld [vmem:[#allocation10 + $0x10] sm:$0xff]  }
 0x1a8   :  { %1864 = vmatpush3.bf16.msra.mxu1 %v1926_v43  ;;  %v1928_v45 = vld [vmem:[#allocation10 + $0x20] sm:$0xff]  }
 0x1a9   :  { %v520_v46 = vrot.slane %v510_v44, %v519_v41  ;;  %1865 = vmatprep.subr.bf16.mxu1 %v2227_v0  ;;  %v1927_v44 = vld [vmem:[#allocation10 + $0x18] sm:$0xff]   ;;  %v1932_v43 = vld [vmem:[#allocation11] ss:$16 sps:$4 sm:$0xff]  }
 0x1ab   :  { %v521_v49 = vcombine.high %v520_v46, %v520_v46  ;;  %v528_v50 = vrot.slane %v520_v46, %v519_v41  ;;  %v1929_v46 = vld [vmem:[#allocation10 + $0x28] sm:$0xff]  }
 0x1ac   :  { %1866 = vmatpush3.bf16.msra.mxu1 %v1927_v44  ;;  %v1935_v44 = vld [vmem:[#allocation11 + $0x8] ss:$16 sps:$4 sm:$0xff]  }
 0x1ad   :  { %v539_v52 = vrot.slane %v528_v50, %v2487_v47  ;;  %v535_v53 = vrot.slane %v521_v49, %v519_v41  ;;  %1867 = vmatprep.subr.bf16.mxu1 %v2227_v0  ;;  %v1931_v49 = vld [vmem:[#allocation10 + $0x38] sm:$0xff]  }
 0x1ae   :  { %v1619_v50 = vld [vmem:[%s2607_s7] ss:$0 sm:$0xff] }
 0x1af   :  { %v546_v55 = vmul.f32 %v539_v52, %v270_v51  ;;  %v543_v56 = vrot.slane %v535_v53, %v2487_v47  ;;  %v382_v51 = vadd.f32 %v1619_v50, %v381_v21  ;;  %v385_v52 = vadd.f32 %v1619_v50, %v384_v12  ;;  %v1946_v50 = vld [vmem:[#allocation11 + $0x44] ss:$16 sps:$4 sm:$0xff]  }
 0x1b0   :  { %1868 = vmatpush3.bf16.msra.mxu1 %v1928_v45  ;;  %v389_v21 = vunpack.c.l.bf16 %v2450_v10  ;;  %v1940_v45 = vld [vmem:[#allocation11 + $0x24] ss:$16 sps:$4 sm:$0xff]  }
 0x1b1   :  { %548 = vadd.xlane.f32.xlu0 %v546_v55  ;;  %v547_v57 = vmul.f32 %v543_v56, %v273_v54  ;;  %1869 = vmatprep.subr.bf16.mxu1 %v2227_v0 }
 0x1b4   :  { %1870 = vmatpush3.bf16.msra.mxu1 %v1929_v46  ;;  %v1943_v46 = vld [vmem:[#allocation11 + $0x2c] ss:$16 sps:$4 sm:$0xff]  }
 0x1b5   :  { %550 = vadd.xlane.f32.xlu0 %v547_v57  ;;  %1871 = vmatprep.subr.bf16.mxu1 %v2227_v0 }
 0x1b8   :  { %1872 = vmatpush3.bf16.msra.mxu1 %v1930_v48  ;;  %v1938_v48 = vld [vmem:[#allocation11 + $0x20] ss:$16 sps:$4 sm:$0xff]  }
 0x1b9   :  { %1873 = vmatprep.subr.bf16.mxu1 %v2227_v0 }
 0x1bc   :  { %1874 = vmatpush3.bf16.msra.mxu1 %v1931_v49  ;;  %v1941_v49 = vld [vmem:[#allocation11 + $0x28] ss:$16 sps:$4 sm:$0xff]  }
 0x23e   :  { %v549_v60 = vpop.xlane.xlu0 %548 }
 0x23f   :  { %v570_v61 = vadd.f32 %v564_v59, %v549_v60 }
 0x241   :  { %575 = vperm.xlu0 %1895, %v570_v61  }
 0x242   :  { %v551_v63 = vpop.xlane.xlu0 %550 }
 0x243   :  { %v571_v1 = vadd.f32 %v567_v62, %v551_v63 }
 0x245   :  { %578 = vperm.xlu1 %1896, %v571_v1  }
 0x2c0   :  { %v576_v15 = vpop.permute.xlu0 %575 }
 0x2c1   :  { %v585_v17 = vrot.slane %v576_v15, %v584_v14 }
 0x2c4   :  { %v579_v16 = vpop.permute.xlu1 %578 }
 0x2c5   :  { %v589_v18 = vrot.slane %v579_v16, %v584_v14 }
 0x2c7   :  { %v590_v19 = vsel %vm418_vm1, %v589_v18, %v585_v17 }
 0x2c8   :  { %v593_v20 = vsel %vm592_vm2, %v590_v19, -inf  ;;  %v1641_v19 = vld [vmem:[%s2609_s9] ss:$0 sm:$0xff] }
 0x2c9   :  { %594 = vmax.xlane.f32.xlu1 %v593_v20 }
 0x356   :  { %v595_v25 = vpop.xlane.xlu1 %594 }
 0x357   :  { %v600_v26 = vrot.slane %v595_v25, %v2487_v47  ;;  %v604_v27 = vrot.slane %v595_v25, %v603_v24  ;;  %v388_v25 = vunpack.c.l.bf16 %v2448_v9 }
 0x359   :  { %v607_v28 = vsub.f32 %v570_v61, %v600_v26  ;;  %v608_v29 = vsub.f32 %v571_v1, %v604_v27 }
 0x35b   :  { %v609_v30 = vmul.f32 1.442695, %v607_v28  ;;  %v611_v31 = vmul.f32 1.442695, %v608_v29 }
 0x35d   :  { %2012 = vpow2.f32 %v609_v30 }
 0x35e   :  { %2014 = vpow2.f32 %v611_v31 }
 0x367   :  { %v2013_v32 = vpop.eup %2012 }
 0x368   :  { %v2015_v33 = vpop.eup %2014  ;;  %616 = vperm.xlu1 %1896, %v2013_v32  }
 0x369   :  { %619 = vperm.xlu0 %1895, %v2015_v33  }
 0x3e7   :  { %v617_v36 = vpop.permute.xlu1 %616 }
 0x3e8   :  { %v620_v38 = vpop.permute.xlu0 %619  ;;  %v624_v39 = vrot.slane %v617_v36, %v584_v14  ;;  %v636_v53 = vmul.f32 %v617_v36, %v382_v51  ;;  %v1949_v51 = vld [vmem:[#allocation11 + $0x4c] ss:$16 sps:$4 sm:$0xff]  }
 0x3e9   :  { %v628_v40 = vrot.slane %v620_v38, %v584_v14  ;;  %v637_v54 = vmul.f32 %v620_v38, %v385_v52  ;;  %v1944_v52 = vld [vmem:[#allocation11 + $0x40] ss:$16 sps:$4 sm:$0xff]  }
 0x3ea   :  { %v638_v55 = vrot.slane %v636_v53, 4 }
 0x3eb   :  { %v629_v41 = vsel %vm418_vm1, %v628_v40, %v624_v39  ;;  %v644_v56 = vrot.slane %v637_v54, 4 }
 0x3ec   :  { %v631_v42 = vsel %vm592_vm2, %v629_v41, 0.0  ;;  %v639_v57 = vadd.f32 %v638_v55, %v636_v53  ;;  %v1934_v41 = vld [vmem:[#allocation11 + $0x4] ss:$16 sps:$4 sm:$0xff]   ;;  %v1947_v53 = vld [vmem:[#allocation11 + $0x48] ss:$16 sps:$4 sm:$0xff]  }
 0x3ed   :  { %632 = vadd.xlane.f32.xlu0 %v631_v42  ;;  %v645_v59 = vadd.f32 %v644_v56, %v637_v54  ;;  %v1937_v42 = vld [vmem:[#allocation11 + $0xc] ss:$16 sps:$4 sm:$0xff]   ;;  %1062 = vmatprep.subr.bf16.mxu0 %v1934_v41  ;;  %v1952_v54 = vld [vmem:[#allocation11 + $0x64] ss:$16 sps:$4 sm:$0xff]   ;;  %v1950_v56 = vld [vmem:[#allocation11 + $0x60] ss:$16 sps:$4 sm:$0xff]  }
 0x3ee   :  { %v640_v60 = vrot.slane %v639_v57, 2  ;;  %1103 = vmatprep.subr.bf16.mxu1 %v1937_v42  ;;  %1063 = vmatpush1.bf16.msra.mxu0 %v1932_v43  ;;  %v1955_v55 = vld [vmem:[#allocation11 + $0x6c] ss:$16 sps:$4 sm:$0xff]   ;;  %v1989_v41 = vld [vmem:[#allocation13 + $0xd0] sm:$0xff]  }
 0x3ef   :  { %v646_v61 = vrot.slane %v645_v59, 2  ;;  %1064 = vmatprep.subr.bf16.mxu0 %v1940_v45  ;;  %v1990_v42 = vld [vmem:[#allocation13 + $0x10] sm:$0xff]   ;;  %v1993_v45 = vld [vmem:[#allocation13 + $0xd8] sm:$0xff]  }
 0x3f0   :  { %v641_v63 = vadd.f32 %v640_v60, %v639_v57  ;;  %v1953_v57 = vld [vmem:[#allocation11 + $0x68] ss:$16 sps:$4 sm:$0xff]   ;;  %v1961_v60 = vld [vmem:[#allocation11 + $0x8c] ss:$16 sps:$4 sm:$0xff]   ;;  %v1991_v43 = vld [vmem:[#allocation13 + $0x90] sm:$0xff]  }
 0x3f1   :  { %v647_v1 = vadd.f32 %v646_v61, %v645_v59  ;;  %v1958_v59 = vld [vmem:[#allocation11 + $0x84] ss:$16 sps:$4 sm:$0xff]   ;;  %v1956_v61 = vld [vmem:[#allocation11 + $0x80] ss:$16 sps:$4 sm:$0xff]  }
 0x3f2   :  { %v642_v0 = vrot.slane %v641_v63, 1  ;;  %1065 = vmatpush1.bf16.msra.mxu0 %v1938_v48  ;;  %v1995_v48 = vld [vmem:[#allocation13 + $0x98] sm:$0xff]  }
 0x3f3   :  { %v648_v2 = vrot.slane %v647_v1, 1  ;;  %1066 = vmatprep.subr.bf16.mxu0 %v1946_v50  ;;  %v1997_v50 = vld [vmem:[#allocation13 + $0xe0] sm:$0xff]  }
 0x3f4   :  { %v643_v3 = vadd.f32 %v642_v0, %v641_v63  ;;  %v1964_v63 = vld [vmem:[#allocation11 + $0xa4] ss:$16 sps:$4 sm:$0xff]   ;;  %v1962_v0 = vld [vmem:[#allocation11 + $0xa0] ss:$16 sps:$4 sm:$0xff]  }
 0x3f5   :  { %v649_v5 = vadd.f32 %v648_v2, %v647_v1  ;;  %v1967_v1 = vld [vmem:[#allocation11 + $0xac] ss:$16 sps:$4 sm:$0xff]   ;;  %v1965_v2 = vld [vmem:[#allocation11 + $0xa8] ss:$16 sps:$4 sm:$0xff]  }
 0x3f6   :  { %1067 = vmatpush1.bf16.msra.mxu0 %v1944_v52  ;;  %v1999_v52 = vld [vmem:[#allocation13 + $0xa0] sm:$0xff]  }
 0x3f7   :  { %1068 = vmatprep.subr.bf16.mxu0 %v1952_v54  ;;  %v2001_v54 = vld [vmem:[#allocation13 + $0xe8] sm:$0xff]  }
 0x3fa   :  { %1069 = vmatpush1.bf16.msra.mxu0 %v1950_v56  ;;  %v2003_v56 = vld [vmem:[#allocation13 + $0xa8] sm:$0xff]  }
 0x3fb   :  { %1070 = vmatprep.subr.bf16.mxu0 %v1958_v59  ;;  %v2005_v59 = vld [vmem:[#allocation13 + $0xf0] sm:$0xff]  }
 0x3fe   :  { %1071 = vmatpush1.bf16.msra.mxu0 %v1956_v61  ;;  %v2007_v61 = vld [vmem:[#allocation13 + $0xb0] sm:$0xff]  }
 0x3ff   :  { %1072 = vmatprep.subr.bf16.mxu0 %v1964_v63  ;;  %v2009_v63 = vld [vmem:[#allocation13 + $0xf8] sm:$0xff]  }
 0x402   :  { %1073 = vmatpush1.bf16.msra.mxu0 %v1962_v0  ;;  %v2011_v0 = vld [vmem:[#allocation13 + $0xb8] sm:$0xff]  }
 0x47a   :  { %v633_v62 = vpop.xlane.xlu0 %632 }
 0x47b   :  { %2016 = vrcp.f32 %v633_v62  ;;  %v1959_v62 = vld [vmem:[#allocation11 + $0x88] ss:$16 sps:$4 sm:$0xff]  }
 0x485   :  { %v2017_v4 = vpop.eup %2016 }
 0x486   :  { %v652_v6 = vrot.slane %v2017_v4, 1  ;;  %v655_v7 = vmul.f32 %v2017_v4, %v643_v3  ;;  %v1970_v3 = vld [vmem:[#allocation11 + $0xc4] ss:$16 sps:$4 sm:$0xff]   ;;  %v1973_v4 = vld [vmem:[#allocation11 + $0xcc] ss:$16 sps:$4 sm:$0xff]  }
 0x487   :  { %1074 = vmatprep.subr.bf16.mxu0 %v1970_v3  ;;  %v872_v3 = vld [vmem:[%s2613_s13] sm:$0xf] }
 0x488   :  { %v656_v8 = vmul.f32 %v652_v6, %v649_v5  ;;  %v657_v11 = vpack.c.bf16 %v655_v7, %v655_v7  ;;  %v1968_v5 = vld [vmem:[#allocation11 + $0xc0] ss:$16 sps:$4 sm:$0xff]   ;;  %v1971_v6 = vld [vmem:[#allocation11 + $0xc8] ss:$16 sps:$4 sm:$0xff]   ;;  %v1976_v7 = vld [vmem:[#allocation11 + $0xe4] ss:$16 sps:$4 sm:$0xff]  }
 0x489   :  { %1075 = vmatpush1.bf16.msra.mxu0 %v1968_v5  ;;  %v877_v5 = vrot.slane %v872_v3, %v2487_v47 }
 0x48a   :  { %v658_v13 = vpack.c.bf16 %v656_v8, %v656_v8  ;;  %v684_v15 = vunpack.c.l.b16 %v657_v11  ;;  %v1979_v8 = vld [vmem:[#allocation11 + $0xec] ss:$16 sps:$4 sm:$0xff]   ;;  %v1974_v11 = vld [vmem:[#allocation11 + $0xe0] ss:$16 sps:$4 sm:$0xff]   ;;  %1076 = vmatprep.subr.bf16.mxu0 %v1976_v7  ;;  %v881_v7 = vrot.slane %v872_v3, %v603_v24 }
 0x48c   :  { %v685_v14 = vunpack.c.l.b16 %v658_v13  ;;  %v1977_v13 = vld [vmem:[#allocation11 + $0xe8] ss:$16 sps:$4 sm:$0xff]  }
 0x48d   :  { %1077 = vmatpush1.bf16.msra.mxu0 %v1974_v11 }
 0x48e   :  { %v686_v16 = vrot.slane %v685_v14, 7 }
 0x490   :  { %v687_v17 = vsel %vm418_vm1, %v686_v16, %v684_v15 }
 0x491   :  { %v688_v18 = vpack.c.b16 %v687_v17, %v687_v17 }
 0x493   :  { %1876 = vmatmul.mubr.bf16.vlgmr.msra.gmra.mrb[4].mxu1 %v688_v18  ;;  %v1650_v18 = vld [vmem:[%s2610_s10] ss:$0 sm:$0xff] }
 0x494   :  { %1135 = vmatprep.mubr.bf16.mxu1 %v2230_v58  ;;  %1104 = vmatpush1.bf16.msra.mxu1 %v1935_v44  ;;  %v1992_v44 = vld [vmem:[#allocation13 + $0x58] sm:$0xff]  }
 0x495   :  { %1105 = vmatprep.subr.bf16.mxu1 %v1943_v46  ;;  %v1994_v46 = vld [vmem:[#allocation13 + $0x18] sm:$0xff]  }
 0x498   :  { %1106 = vmatpush1.bf16.msra.mxu1 %v1941_v49  ;;  %v1996_v49 = vld [vmem:[#allocation13 + $0x60] sm:$0xff]  }
 0x499   :  { %1107 = vmatprep.subr.bf16.mxu1 %v1949_v51  ;;  %v1998_v51 = vld [vmem:[#allocation13 + $0x20] sm:$0xff]  }
 0x49c   :  { %1108 = vmatpush1.bf16.msra.mxu1 %v1947_v53  ;;  %v2000_v53 = vld [vmem:[#allocation13 + $0x68] sm:$0xff]  }
 0x49d   :  { %1109 = vmatprep.subr.bf16.mxu1 %v1955_v55  ;;  %v2002_v55 = vld [vmem:[#allocation13 + $0x28] sm:$0xff]  }
 0x4a0   :  { %1110 = vmatpush1.bf16.msra.mxu1 %v1953_v57  ;;  %v2004_v57 = vld [vmem:[#allocation13 + $0x70] sm:$0xff]  }
 0x4a1   :  { %1111 = vmatprep.subr.bf16.mxu1 %v1961_v60  ;;  %v2006_v60 = vld [vmem:[#allocation13 + $0x30] sm:$0xff]  }
 0x4a4   :  { %1112 = vmatpush1.bf16.msra.mxu1 %v1959_v62  ;;  %v2008_v62 = vld [vmem:[#allocation13 + $0x78] sm:$0xff]  }
 0x4a5   :  { %1113 = vmatprep.subr.bf16.mxu1 %v1967_v1  ;;  %v2010_v1 = vld [vmem:[#allocation13 + $0x38] sm:$0xff]  }
 0x4a8   :  { %1114 = vmatpush1.bf16.msra.mxu1 %v1965_v2  ;;  %v884_v2 = vsub.s32 2, %v2480_v37 }
 0x4a9   :  { %1115 = vmatprep.subr.bf16.mxu1 %v1973_v4  ;;  %v888_v4 = vsub.s32 3, %v2480_v37 }
 0x4ac   :  { %1116 = vmatpush1.bf16.msra.mxu1 %v1971_v6  ;;  %v885_v6 = vrot.slane %v872_v3, %v884_v2 }
 0x4ad   :  { %1117 = vmatprep.subr.bf16.mxu1 %v1979_v8  ;;  %v889_v8 = vrot.slane %v872_v3, %v888_v4 }
 0x4b0   :  { %1118 = vmatpush1.bf16.msra.mxu1 %v1977_v13 }
 0x566   :  { %v772_v20 = vpop.f32.mrb[4].mxu1 }
 0x567   :  { %v773_v22 = vadd.f32 %v1641_v19, %v772_v20  ;;  %v1877_v12 = vpop.f32.mrb[5].mxu1 }
 0x568   :  { %v775_v23 = vpop.f32.mrb[6].mxu1 }
 0x569   :  { %v779_v26 = vrot.slane %v773_v22, 1  ;;  %v1878_v27 = vpop.f32.mrb[7].mxu1  ;;  %v782_v29 = vadd.f32 %v773_v22, %v388_v25 }
 0x56b   :  { %v783_v28 = vadd.f32 %v779_v26, %v389_v21  ;;  %v1651_v21 = vld [vmem:[%s2611_s11] ss:$0 sm:$0xff] }
 0x56d   :  { %v788_v30 = vrot.slane %v783_v28, 7 }
 0x56f   :  { %v789_v58 = vsel %vm418_vm1, %v788_v30, %v782_v29 }
 0x570   :  { %v792_v31 = vsel %vm791_vm3, %v789_v58, 0.0 }
 0x571   :  { %793 = vadd.xlane.f32.xlu1 %v792_v31 }
 0x5fe   :  { %v794_v32 = vpop.xlane.xlu1 %793 }
 0x5ff   :  { %v796_v33 = vmul.f32 0.0078125, %v794_v32 }
 0x601   :  { %v798_v34 = vrot.slane %v796_v33, 1  ;;  %v2537_v10 = vsub.f32 %v782_v29, %v796_v33  ;;  %v1980_v33 = vld [vmem:[#allocation13 + $0x40] sm:$0xff]  }
 0x602   :  { %1755 = vmatprep.subr.bf16.mxu0 %v1980_v33 }
 0x603   :  { %v2539_v35 = vsub.f32 %v783_v28, %v798_v34  ;;  %v803_v36 = vmul.f32 %v2537_v10, %v2537_v10  ;;  %v1981_v34 = vld [vmem:[#allocation13 + $0xc0] sm:$0xff]  }
 0x604   :  { %1777 = vmatprep.subr.bf16.mxu1 %v1981_v34 }
 0x605   :  { %v804_v9 = vmul.f32 %v2539_v35, %v2539_v35 }
 0x607   :  { %v807_v38 = vrot.slane %v804_v9, 7  ;;  %v1984_v9 = vld [vmem:[#allocation13 + $0x48] sm:$0xff]  }
 0x609   :  { %v808_v39 = vsel %vm418_vm1, %v807_v38, %v803_v36  ;;  %v1985_v36 = vld [vmem:[#allocation13 + $0xc8] sm:$0xff]  }
 0x60a   :  { %v810_v40 = vsel %vm791_vm3, %v808_v39, 0.0  ;;  %v1986_v38 = vld [vmem:[#allocation13 + $0x8] sm:$0xff]  }
 0x60b   :  { %811 = vadd.xlane.f32.xlu0 %v810_v40  ;;  %v1987_v39 = vld [vmem:[#allocation13 + $0x88] sm:$0xff]   ;;  %v1988_v40 = vld [vmem:[#allocation13 + $0x50] sm:$0xff]  }
 0x698   :  { %v812_v14 = vpop.xlane.xlu0 %811 }
 0x699   :  { %v813_v15 = vmul.f32 0.0078125, %v812_v14 }
 0x69b   :  { %v814_v16 = vadd.f32 1e-05, %v813_v15 }
 0x69d   :  { %2018 = vrsqrt.f32 %v814_v16 }
 0x6a7   :  { %v2019_v17 = vpop.eup %2018 }
 0x6a8   :  { %v817_v19 = vrot.slane %v2019_v17, 1  ;;  %v820_v20 = vmul.f32 %v2019_v17, %v2537_v10  ;;  %v1982_v10 = vld [vmem:[#allocation13] sm:$0xff]  }
 0x6aa   :  { %v821_v22 = vmul.f32 %v817_v19, %v2539_v35  ;;  %v828_v12 = vmul.f32 %v1650_v18, %v820_v20  ;;  %v1983_v35 = vld [vmem:[#allocation13 + $0x80] sm:$0xff]  }
 0x6ac   :  { %v829_v23 = vmul.f32 %v1650_v18, %v821_v22  ;;  %v2555_v25 = vadd.f32 %v1651_v21, %v828_v12 }
 0x6ae   :  { %v2557_v26 = vadd.f32 %v1651_v21, %v829_v23  ;;  %v838_v27 = vpack.c.bf16 %v2555_v25, %v2555_v25 }
 0x6b0   :  { %v839_v28 = vpack.c.bf16 %v2557_v26, %v2557_v26  ;;  %v896_v30 = vunpack.c.l.b16 %v838_v27 }
 0x6b2   :  { %v897_v29 = vunpack.c.l.b16 %v839_v28 }
 0x6b4   :  { %v898_v58 = vrot.slane %v897_v29, 7 }
 0x6b6   :  { %v899_v31 = vsel %vm418_vm1, %v898_v58, %v896_v30 }
 0x6b7   :  { %v900_v32 = vpack.c.b16 %v899_v31, %v899_v31 }
 0x6b9   :  { %1095 = vmatmul.mubr.bf16.vlgmr.msra.gmra.mrb[8].mxu0 %v900_v32  ;;  %1136 = vmatmul.mubr.bf16.vlgmr.msra.gmra.mrb[8].mxu1 %v900_v32 }
 0x6ba   :  { %1756 = vmatpush3.bf16.msra.mxu0 %v1982_v10  ;;  %1778 = vmatpush3.bf16.msra.mxu1 %v1983_v35 }
 0x6bb   :  { %1757 = vmatprep.subr.bf16.mxu0 %v1984_v9  ;;  %1779 = vmatprep.subr.bf16.mxu1 %v1985_v36 }
 0x6be   :  { %1758 = vmatpush3.bf16.msra.mxu0 %v1986_v38  ;;  %1780 = vmatpush3.bf16.msra.mxu1 %v1987_v39 }
 0x6bf   :  { %1759 = vmatprep.subr.bf16.mxu0 %v1988_v40  ;;  %1781 = vmatprep.subr.bf16.mxu1 %v1989_v41 }
 0x6c2   :  { %1760 = vmatpush3.bf16.msra.mxu0 %v1990_v42  ;;  %1782 = vmatpush3.bf16.msra.mxu1 %v1991_v43 }
 0x6c3   :  { %1761 = vmatprep.subr.bf16.mxu0 %v1992_v44  ;;  %1783 = vmatprep.subr.bf16.mxu1 %v1993_v45 }
 0x6c6   :  { %1762 = vmatpush3.bf16.msra.mxu0 %v1994_v46  ;;  %1784 = vmatpush3.bf16.msra.mxu1 %v1995_v48 }
 0x6c7   :  { %1763 = vmatprep.subr.bf16.mxu0 %v1996_v49  ;;  %1785 = vmatprep.subr.bf16.mxu1 %v1997_v50 }
 0x6ca   :  { %1764 = vmatpush3.bf16.msra.mxu0 %v1998_v51  ;;  %1786 = vmatpush3.bf16.msra.mxu1 %v1999_v52 }
 0x6cb   :  { %1765 = vmatprep.subr.bf16.mxu0 %v2000_v53  ;;  %1787 = vmatprep.subr.bf16.mxu1 %v2001_v54 }
 0x6ce   :  { %1766 = vmatpush3.bf16.msra.mxu0 %v2002_v55  ;;  %1788 = vmatpush3.bf16.msra.mxu1 %v2003_v56 }
 0x6cf   :  { %1767 = vmatprep.subr.bf16.mxu0 %v2004_v57  ;;  %1789 = vmatprep.subr.bf16.mxu1 %v2005_v59 }
 0x6d2   :  { %1768 = vmatpush3.bf16.msra.mxu0 %v2006_v60  ;;  %1790 = vmatpush3.bf16.msra.mxu1 %v2007_v61 }
 0x6d3   :  { %1769 = vmatprep.subr.bf16.mxu0 %v2008_v62  ;;  %1791 = vmatprep.subr.bf16.mxu1 %v2009_v63 }
 0x6d6   :  { %1770 = vmatpush3.bf16.msra.mxu0 %v2010_v1  ;;  %1792 = vmatpush3.bf16.msra.mxu1 %v2011_v0  ;;  %v1684_v0 = vld [vmem:[%s2615_s15] ss:$0 sm:$0xff] }
 0x78c   :  { %v1096_v11 = vpop.f32.mrb[8].mxu0  ;;  %v1137_v13 = vpop.f32.mrb[8].mxu1 }
 0x78d   :  { %v1097_v14 = vadd.f32 %v1096_v11, %v877_v5  ;;  %v1138_v15 = vadd.f32 %v1137_v13, %v885_v6  ;;  %v1098_v16 = vpop.f32.mrb[9].mxu0  ;;  %v1139_v17 = vpop.f32.mrb[9].mxu1 }
 0x78e   :  { %v1099_v18 = vadd.f32 %v1098_v16, %v881_v7  ;;  %v1140_v19 = vadd.f32 %v1139_v17, %v889_v8  ;;  %v1100_v20 = vpop.f32.mrb[10].mxu0  ;;  %v1141_v21 = vpop.f32.mrb[10].mxu1 }
 0x78f   :  { %v1144_v22 = vmul.f32 %v1097_v14, %v1097_v14  ;;  %v1146_v12 = vmul.f32 %v1138_v15, %v1138_v15  ;;  %v1101_v23 = vpop.f32.mrb[11].mxu0  ;;  %v1142_v27 = vpop.f32.mrb[11].mxu1 }
 0x790   :  { %v1145_v47 = vmul.f32 %v1099_v18, %v1099_v18  ;;  %v1147_v28 = vmul.f32 %v1140_v19, %v1140_v19 }
 0x791   :  { %v1148_v29 = vmul.f32 %v1144_v22, %v1097_v14  ;;  %v1150_v37 = vmul.f32 %v1146_v12, %v1138_v15 }
 0x792   :  { %v1149_v24 = vmul.f32 %v1145_v47, %v1099_v18  ;;  %v1151_v30 = vmul.f32 %v1147_v28, %v1140_v19 }
 0x793   :  { %v1152_v58 = vmul.f32 0.044715, %v1148_v29  ;;  %v1154_v31 = vmul.f32 0.044715, %v1150_v37 }
 0x794   :  { %v1153_v32 = vmul.f32 0.044715, %v1149_v24  ;;  %v1155_v33 = vmul.f32 0.044715, %v1151_v30 }
 0x795   :  { %v1156_v34 = vadd.f32 %v1152_v58, %v1097_v14  ;;  %v1158_v10 = vadd.f32 %v1154_v31, %v1138_v15 }
 0x796   :  { %v1157_v35 = vadd.f32 %v1153_v32, %v1099_v18  ;;  %v1159_v9 = vadd.f32 %v1155_v33, %v1140_v19  ;;  %v1717_v33 = vld [vmem:[%s2616_s16] ss:$0 sm:$0xff] }
 0x797   :  { %v1160_v36 = vmul.f32 0.7978846, %v1156_v34  ;;  %v1162_v38 = vmul.f32 0.7978846, %v1158_v10 }
 0x798   :  { %v1161_v39 = vmul.f32 0.7978846, %v1157_v35  ;;  %v1163_v40 = vmul.f32 0.7978846, %v1159_v9  ;;  %v1718_v9 = vld [vmem:[%s2617_s17] ss:$0 sm:$0xff] }
 0x799   :  { %2020 = vtanh.f32 %v1160_v36 }
 0x79a   :  { %2022 = vtanh.f32 %v1162_v38 }
 0x79b   :  { %2024 = vtanh.f32 %v1161_v39 }
 0x79c   :  { %2026 = vtanh.f32 %v1163_v40 }
 0x7a3   :  { %v2021_v41 = vpop.eup %2020 }
 0x7a4   :  { %v2023_v42 = vpop.eup %2022  ;;  %v1168_v43 = vadd.f32 1.0, %v2021_v41 }
 0x7a5   :  { %v2025_v44 = vpop.eup %2024  ;;  %v1170_v45 = vadd.f32 1.0, %v2023_v42 }
 0x7a6   :  { %v2027_v46 = vpop.eup %2026  ;;  %v1169_v48 = vadd.f32 1.0, %v2025_v44  ;;  %v1172_v49 = vmul.f32 0.5, %v1168_v43 }
 0x7a7   :  { %v1171_v50 = vadd.f32 1.0, %v2027_v46  ;;  %v1174_v51 = vmul.f32 0.5, %v1170_v45 }
 0x7a8   :  { %v1173_v52 = vmul.f32 0.5, %v1169_v48  ;;  %v1176_v54 = vmul.f32 %v1172_v49, %v1097_v14 }
 0x7a9   :  { %v1175_v53 = vmul.f32 0.5, %v1171_v50  ;;  %v1178_v56 = vmul.f32 %v1174_v51, %v1138_v15 }
 0x7aa   :  { %v1177_v55 = vmul.f32 %v1173_v52, %v1099_v18  ;;  %v1180_v61 = vpack.c.bf16 %v1176_v54, %v1176_v54 }
 0x7ab   :  { %v1179_v57 = vmul.f32 %v1175_v53, %v1140_v19  ;;  %v1182_v62 = vpack.c.bf16 %v1178_v56, %v1178_v56 }
 0x7ac   :  { %v1181_v59 = vpack.c.bf16 %v1177_v55, %v1177_v55 }
 0x7ad   :  { %v1183_v60 = vpack.c.bf16 %v1179_v57, %v1179_v57 }
 0x7ae   :  { %1479 = vmatprep.mubr.bf16.mxu0 %v1181_v59 }
 0x7af   :  { %1519 = vmatprep.mubr.bf16.mxu1 %v1183_v60  ;;  %1480 = vmatmul.mubr.bf16.vlgmr.msra.gmra.mrb[12].mxu0 %v1180_v61 }
 0x7b0   :  { %1520 = vmatmul.mubr.bf16.vlgmr.msra.gmra.mrb[12].mxu1 %v1182_v62 }
 0x882   :  { %v1771_v63 = vpop.f32.mrb[12].mxu0 }
 0x883   :  { %v1793_v1 = vpop.f32.mrb[12].mxu1  ;;  %v1772_v2 = vpop.f32.mrb[13].mxu0 }
 0x884   :  { %v1773_v3 = vadd.f32 %v1772_v2, %v1771_v63  ;;  %v1794_v4 = vpop.f32.mrb[13].mxu1  ;;  %v1774_v5 = vpop.f32.mrb[14].mxu0 }
 0x885   :  { %v1795_v6 = vadd.f32 %v1794_v4, %v1793_v1  ;;  %v1796_v7 = vpop.f32.mrb[14].mxu1  ;;  %v1775_v8 = vpop.f32.mrb[15].mxu0 }
 0x886   :  { %v1482_v11 = vadd.f32 %v1773_v3, %v1684_v0  ;;  %v1797_v13 = vpop.f32.mrb[15].mxu1 }
 0x888   :  { %v1522_v14 = vadd.f32 %v1795_v6, %v1482_v11 }
 0x88a   :  { %v1528_v15 = vrot.slane %v1522_v14, 1  ;;  %v1531_v17 = vadd.f32 %v1522_v14, %v2555_v25 }
 0x88c   :  { %v1532_v16 = vadd.f32 %v1528_v15, %v2557_v26 }
 0x88e   :  { %v1537_v18 = vrot.slane %v1532_v16, 7 }
 0x890   :  { %v1538_v19 = vsel %vm418_vm1, %v1537_v18, %v1531_v17 }
 0x891   :  { %v1540_v20 = vsel %vm791_vm3, %v1538_v19, 0.0 }
 0x892   :  { %1541 = vadd.xlane.f32.xlu0 %v1540_v20 }
 0x91f   :  { %v1542_v21 = vpop.xlane.xlu0 %1541 }
 0x920   :  { %v1543_v22 = vmul.f32 0.0078125, %v1542_v21 }
 0x922   :  { %v1545_v12 = vrot.slane %v1543_v22, 1  ;;  %v1548_v23 = vsub.f32 %v1531_v17, %v1543_v22 }
 0x924   :  { %v1549_v27 = vsub.f32 %v1532_v16, %v1545_v12  ;;  %v1550_v28 = vmul.f32 %v1548_v23, %v1548_v23 }
 0x926   :  { %v1551_v47 = vmul.f32 %v1549_v27, %v1549_v27 }
 0x928   :  { %v1554_v29 = vrot.slane %v1551_v47, 7 }
 0x92a   :  { %v1555_v37 = vsel %vm418_vm1, %v1554_v29, %v1550_v28 }
 0x92b   :  { %v1557_v26 = vsel %vm791_vm3, %v1555_v37, 0.0 }
 0x92c   :  { %1558 = vadd.xlane.f32.xlu0 %v1557_v26 }
 0x9b9   :  { %v1559_v25 = vpop.xlane.xlu0 %1558 }
 0x9ba   :  { %v1560_v24 = vmul.f32 0.0078125, %v1559_v25 }
 0x9bc   :  { %v1561_v30 = vadd.f32 1e-05, %v1560_v24 }
 0x9be   :  { %2028 = vrsqrt.f32 %v1561_v30 }
 0x9c8   :  { %v2029_v58 = vpop.eup %2028 }
 0x9c9   :  { %v1564_v31 = vrot.slane %v2029_v58, 1  ;;  %v1567_v32 = vmul.f32 %v2029_v58, %v1548_v23 }
 0x9cb   :  { %v1568_v34 = vmul.f32 %v1564_v31, %v1549_v27  ;;  %v1575_v10 = vmul.f32 %v1717_v33, %v1567_v32 }
 0x9cd   :  { %v1576_v35 = vmul.f32 %v1717_v33, %v1568_v34  ;;  %v1583_v38 = vadd.f32 %v1718_v9, %v1575_v10 }
 0x9cf   :  { %v1584_v36 = vadd.f32 %v1718_v9, %v1576_v35 }
 0x9d1   :  { %v1587_v39 = vrot.slane %v1584_v36, 7 }
 0x9d3   :  { %v1588_v40 = vsel %vm418_vm1, %v1587_v39, %v1583_v38 }
 0x9d4   :  { %1590 = vst [vmem:[#allocation14] sm:$0x3] %v1588_v40 }
 0x9d5   :  { %2195 = shalt.err (!%p2192_p4)
}
 0x9d6   :  { %s2636_s14 = sld [smem:[#allocation23_spill]] }
 0x9dc   :  { %s2196_s17 = scalar_lea.hbm %s2636_s14, 32 }
 0x9dd   :  { %p2197_p5 = scmp.ne.s32.totalorder %s2636_s14, %s2196_s17  ;;  %p2200_p6 = scmp.lt.u32.totalorder %s2196_s17, %s2636_s14 }
 0x9df   :  { %p2202_p7 = pnand %p2200_p6, %p2197_p5 }
 0x9e1   :  { %2205 = shalt.err (!%p2202_p7)
}
 0x9e2   :  { %1600 = dma.vmem_to_hbm [thread:$0]  %s1598_s18, 32, %s2636_s14, [#allocation4]  }
 0x9e3   :  { %2214 = dma.done.wait [#allocation4], 32  }
 0x9e4   :  { %2215 = vsyncadd [#allocation4], 4294967264 }
 0x9e5   :  { %1604 = vsyncpa [#allocation3], 1 }
 0x9e6   :  { %1605 = vsyncpa [#allocation6], 1 }
 0x9e7   :  { %1606 = vsyncpa [#allocation9], 1 }
 0x9e8   :  { %1607 = vsyncpa [#allocation12], 1 }
 0x9e9   :  { %1608 = vsyncpa [#allocation4], 1 }

// kernel: tpu_custom_call.1
= control target key start
LH: loop header
LB: loop body
LE: loop exit
PB: predicated region body
PF: predicated region fallthrough
CT: control target
= control target key end

     0   :  { %s2600_s0 = inlined_call_operand.hbm [shape: bf16[2,8,128], index: 0, kind: input, shape index: {}]   ;;  %s2601_s1 = inlined_call_operand.vmem [shape: f32[2,1,8], index: 1, kind: input, shape index: {}]   ;;  %s2602_s2 = inlined_call_operand.hbm [shape: bf16[128,128], index: 2, kind: input, shape index: {}]   ;;  %s2603_s3 = inlined_call_operand.vmem [shape: f32[1,128], index: 3, kind: input, shape index: {}]   ;;  %s2604_s4 = inlined_call_operand.hbm [shape: bf16[128,128], index: 4, kind: input, shape index: {}]   ;;  %s2605_s5 = inlined_call_operand.vmem [shape: f32[1,128], index: 5, kind: input, shape index: {}]   ;;  %s2606_s6 = inlined_call_operand.hbm [shape: bf16[128,128], index: 6, kind: input, shape index: {}]   ;;  %s2607_s7 = inlined_call_operand.vmem [shape: f32[1,128], index: 7, kind: input, shape index: {}]   ;;  %s2608_s8 = inlined_call_operand.hbm [shape: bf16[128,128], index: 8, kind: input, shape index: {}]   ;;  %s2609_s9 = inlined_call_operand.vmem [shape: f32[1,128], index: 9, kind: input, shape index: {}]   ;;  %s2610_s10 = inlined_call_operand.vmem [shape: f32[1,128], index: 10, kind: input, shape index: {}]   ;;  %s2611_s11 = inlined_call_operand.vmem [shape: f32[1,128], index: 11, kind: input, shape index: {}]   ;;  %s2612_s12 = inlined_call_operand.hbm [shape: bf16[128,512], index: 12, kind: input, shape index: {}]   ;;  %s2613_s13 = inlined_call_operand.vmem [shape: f32[1,512], index: 13, kind: input, shape index: {}]   ;;  %s2614_s14 = inlined_call_operand.hbm [shape: bf16[512,128], index: 14, kind: input, shape index: {}]   ;;  %s2615_s15 = inlined_call_operand.vmem [shape: f32[1,128], index: 15, kind: input, shape index: {}]   ;;  %s2616_s16 = inlined_call_operand.vmem [shape: f32[1,128], index: 16, kind: input, shape index: {}]   ;;  %s2617_s17 = inlined_call_operand.vmem [shape: f32[1,128], index: 17, kind: input, shape index: {}]   ;;  %s2618_s18 = inlined_call_operand.hbm [shape: f32[2,128], index: 18, kind: output, shape index: {}]  }
   0x1   :  { %2627 = sst [smem:[#allocation20_spill]] %s2600_s0 }
   0x2   :  { %2628 = sst [smem:[#allocation21_spill]] %s2601_s1 }
   0x3   :  { %2629 = sst [smem:[#allocation22_spill]] %s2602_s2 }
   0x4   :  { %2630 = sst [smem:[#allocation23_spill]] %s2618_s18 }
   0x5   :  { %23 = vsyncpa [#allocation3], 0 }
   0x6   :  { %24 = vsyncpa [#allocation6], 0 }
   0x7   :  { %25 = vsyncpa [#allocation9], 0 }
   0x8   :  { %26 = vsyncpa [#allocation12], 0 }
   0x9   :  { %27 = vsyncpa [#allocation4], 0  ;;  %s2216_s27 = smov [#allocation5]   ;;  %s2217_s29 = smov [#allocation8]  }
   0xa   :  { %s47_s28 = sshll.u32 %s2216_s27, 4  ;;  %s75_s30 = sshll.u32 %s2217_s29, 4  ;;  %s48_s28 = int_to_ptr.vmem [resolvable:$true] %s47_s28  ;;  %s2327_s30 = int_to_ptr.vmem [resolvable:$true] %s75_s30 }
   0xb   :  { %s2631_s1 = sld [smem:[#allocation22_spill]] }
  0x11   :  { %s2030_s20 = scalar_lea.hbm %s2631_s1, 1024 }
  0x12   :  { %p2031_p0 = scmp.ne.s32.totalorder %s2631_s1, %s2030_s20  ;;  %p2034_p1 = scmp.lt.u32.totalorder %s2030_s20, %s2631_s1 }
  0x14   :  { %p2036_p2 = pnand %p2034_p1, %p2031_p0 }
  0x16   :  { %2039 = shalt.err (!%p2036_p2)
}
  0x17   :  { %s2040_s24 = scalar_lea.vmem %s48_s28, 1024  ;;  %p2045_p4 = scmp.lt.s32.totalorder %s48_s28, %s48_s28 }
  0x18   :  { %p2041_p3 = scmp.ne.s32.totalorder %s48_s28, %s2040_s24  ;;  %p2046_p5 = scmp.lt.s32.totalorder %s2040_s24, %s2040_s24 }
  0x1a   :  { %p2047_p6 = por %p2046_p5, %p2045_p4 }
  0x1c   :  { %p2048_p7 = pnand %p2047_p6, %p2041_p3 }
  0x1e   :  { %2051 = shalt.err (!%p2048_p7)
}
  0x1f   :  { %s2622_s25 = smov 64   ;;  %s2624_s26 = smov 4  }
  0x20   :  { %53 = dma.hbm_to_vmem [thread:$0]  %s2631_s1, 1024, %s48_s28, [#allocation6], %s2622_s25, %s2622_s25, %s2624_s26  }
  0x21   :  { %s2052_s20 = scalar_lea.hbm %s2606_s6, 1024 }
  0x22   :  { %p2053_p8 = scmp.ne.s32.totalorder %s2606_s6, %s2052_s20  ;;  %p2056_p9 = scmp.lt.u32.totalorder %s2052_s20, %s2606_s6 }
  0x24   :  { %p2058_p10 = pnand %p2056_p9, %p2053_p8 }
  0x26   :  { %2061 = shalt.err (!%p2058_p10)
}
  0x27   :  { %s2062_s24 = scalar_lea.vmem %s2327_s30, 1024  ;;  %p2067_p12 = scmp.lt.s32.totalorder %s2327_s30, %s2327_s30 }
  0x28   :  { %p2063_p11 = scmp.ne.s32.totalorder %s2327_s30, %s2062_s24  ;;  %p2068_p13 = scmp.lt.s32.totalorder %s2062_s24, %s2062_s24 }
  0x2a   :  { %p2069_p0 = por %p2068_p13, %p2067_p12 }
  0x2c   :  { %p2070_p1 = pnand %p2069_p0, %p2063_p11 }
  0x2e   :  { %2073 = shalt.err (!%p2070_p1)
}
  0x2f   :  { %81 = dma.hbm_to_vmem [thread:$0]  %s2606_s6, 1024, %s2327_s30, [#allocation9], %s2622_s25, %s2622_s25, %s2624_s26  }
  0x30   :  { %s2220_s27 = smov [#allocation11]   ;;  %s2074_s20 = scalar_lea.hbm %s2612_s12, 4096 }
  0x31   :  { %s107_s29 = sshll.u32 %s2220_s27, 4  ;;  %p2075_p2 = scmp.ne.s32.totalorder %s2612_s12, %s2074_s20  ;;  %s108_s29 = int_to_ptr.vmem [resolvable:$true] %s107_s29 }
  0x32   :  { %p2078_p3 = scmp.lt.u32.totalorder %s2074_s20, %s2612_s12 }
  0x34   :  { %p2080_p4 = pnand %p2078_p3, %p2075_p2 }
  0x36   :  { %2083 = shalt.err (!%p2080_p4)
}
  0x37   :  { %s2084_s24 = scalar_lea.vmem %s108_s29, 4096  ;;  %p2089_p6 = scmp.lt.s32.totalorder %s108_s29, %s108_s29 }
  0x38   :  { %p2085_p5 = scmp.ne.s32.totalorder %s108_s29, %s2084_s24  ;;  %p2090_p7 = scmp.lt.s32.totalorder %s2084_s24, %s2084_s24 }
  0x3a   :  { %p2091_p8 = por %p2090_p7, %p2089_p6 }
  0x3c   :  { %p2092_p9 = pnand %p2091_p8, %p2085_p5 }
  0x3e   :  { %2095 = shalt.err (!%p2092_p9)
}
  0x3f   :  { %s2221_s6 = smov 256   ;;  %s2222_s30 = smov 16  }
  0x40   :  { %113 = dma.hbm_to_vmem [thread:$0]  %s2612_s12, 4096, %s108_s29, [#allocation12], %s2221_s6, %s2221_s6, %s2222_s30  }
  0x41   :  { %s2223_s27 = smov [#allocation2]   ;;  %s2224_s19 = smov [#allocation7]  }
  0x42   :  { %s33_s0 = sshll.u32 %s2223_s27, 4  ;;  %s61_s20 = sshll.u32 %s2224_s19, 4  ;;  %s34_s0 = int_to_ptr.vmem [resolvable:$true] %s33_s0  ;;  %s62_s20 = int_to_ptr.vmem [resolvable:$true] %s61_s20 }
  0x43   :  { %s2632_s2 = sld [smem:[#allocation20_spill]] }
  0x49   :  { %s2096_s23 = scalar_lea.hbm %s2632_s2, 128 }
  0x4a   :  { %p2097_p10 = scmp.ne.s32.totalorder %s2632_s2, %s2096_s23  ;;  %p2100_p11 = scmp.lt.u32.totalorder %s2096_s23, %s2632_s2 }
  0x4c   :  { %p2102_p12 = pnand %p2100_p11, %p2097_p10 }
  0x4e   :  { %2105 = shalt.err (!%p2102_p12)
}
  0x4f   :  { %s2106_s12 = scalar_lea.vmem %s34_s0, 128  ;;  %p2111_p0 = scmp.lt.s32.totalorder %s34_s0, %s34_s0 }
  0x50   :  { %p2107_p13 = scmp.ne.s32.totalorder %s34_s0, %s2106_s12  ;;  %p2112_p1 = scmp.lt.s32.totalorder %s2106_s12, %s2106_s12 }
  0x52   :  { %p2113_p2 = por %p2112_p1, %p2111_p0 }
  0x54   :  { %p2114_p3 = pnand %p2113_p2, %p2107_p13 }
  0x56   :  { %2117 = shalt.err (!%p2114_p3)
}
  0x57   :  { %s2633_s29 = smov 4   ;;  %s2634_s6 = smov 64  }
  0x58   :  { %39 = dma.hbm_to_vmem [thread:$0]  %s2632_s2, 128, %s34_s0, [#allocation3], %s2634_s6, %s2634_s6, %s2633_s29  }
  0x59   :  { %s2118_s26 = scalar_lea.hbm %s2604_s4, 1024 }
  0x5a   :  { %p2119_p4 = scmp.ne.s32.totalorder %s2604_s4, %s2118_s26  ;;  %p2122_p5 = scmp.lt.u32.totalorder %s2118_s26, %s2604_s4 }
  0x5c   :  { %p2124_p6 = pnand %p2122_p5, %p2119_p4 }
  0x5e   :  { %2127 = shalt.err (!%p2124_p6)
}
  0x5f   :  { %s2128_s22 = scalar_lea.vmem %s62_s20, 1024  ;;  %p2133_p8 = scmp.lt.s32.totalorder %s62_s20, %s62_s20 }
  0x60   :  { %p2129_p7 = scmp.ne.s32.totalorder %s62_s20, %s2128_s22  ;;  %p2134_p9 = scmp.lt.s32.totalorder %s2128_s22, %s2128_s22 }
  0x62   :  { %p2135_p10 = por %p2134_p9, %p2133_p8 }
  0x64   :  { %p2136_p11 = pnand %p2135_p10, %p2129_p7 }
  0x66   :  { %2139 = shalt.err (!%p2136_p11)
}
  0x67   :  { %67 = dma.hbm_to_vmem [thread:$0]  %s2604_s4, 1024, %s62_s20, [#allocation6], %s2634_s6, %s2634_s6, %s2633_s29  }
  0x68   :  { %s2225_s23 = smov [#allocation10]   ;;  %s2226_s12 = smov [#allocation13]  }
  0x69   :  { %s89_s24 = sshll.u32 %s2225_s23, 4  ;;  %s121_s30 = sshll.u32 %s2226_s12, 4  ;;  %s90_s24 = int_to_ptr.vmem [resolvable:$true] %s89_s24  ;;  %s122_s30 = int_to_ptr.vmem [resolvable:$true] %s121_s30 }
  0x6a   :  { %s2140_s18 = scalar_lea.hbm %s2608_s8, 1024 }
  0x6b   :  { %p2141_p12 = scmp.ne.s32.totalorder %s2608_s8, %s2140_s18  ;;  %p2144_p13 = scmp.lt.u32.totalorder %s2140_s18, %s2608_s8 }
  0x6d   :  { %p2146_p0 = pnand %p2144_p13, %p2141_p12 }
  0x6f   :  { %2149 = shalt.err (!%p2146_p0)
}
  0x70   :  { %s2150_s4 = scalar_lea.vmem %s90_s24, 1024  ;;  %p2155_p2 = scmp.lt.s32.totalorder %s90_s24, %s90_s24 }
  0x71   :  { %p2151_p1 = scmp.ne.s32.totalorder %s90_s24, %s2150_s4  ;;  %p2156_p3 = scmp.lt.s32.totalorder %s2150_s4, %s2150_s4 }
  0x73   :  { %p2157_p4 = por %p2156_p3, %p2155_p2 }
  0x75   :  { %p2158_p5 = pnand %p2157_p4, %p2151_p1 }
  0x77   :  { %2161 = shalt.err (!%p2158_p5)
}
  0x78   :  { %95 = dma.hbm_to_vmem [thread:$0]  %s2608_s8, 1024, %s90_s24, [#allocation9], %s2634_s6, %s2634_s6, %s2633_s29  }
  0x79   :  { %s2162_s2 = scalar_lea.hbm %s2614_s14, 4096 }
  0x7a   :  { %p2163_p6 = scmp.ne.s32.totalorder %s2614_s14, %s2162_s2  ;;  %p2166_p7 = scmp.lt.u32.totalorder %s2162_s2, %s2614_s14 }
  0x7c   :  { %p2168_p8 = pnand %p2166_p7, %p2163_p6 }
  0x7e   :  { %2171 = shalt.err (!%p2168_p8)
}
  0x7f   :  { %s2172_s18 = scalar_lea.vmem %s122_s30, 4096  ;;  %p2177_p10 = scmp.lt.s32.totalorder %s122_s30, %s122_s30 }
  0x80   :  { %p2173_p9 = scmp.ne.s32.totalorder %s122_s30, %s2172_s18  ;;  %p2178_p11 = scmp.lt.s32.totalorder %s2172_s18, %s2172_s18 }
  0x82   :  { %p2179_p12 = por %p2178_p11, %p2177_p10 }
  0x84   :  { %p2180_p13 = pnand %p2179_p12, %p2173_p9 }
  0x86   :  { %2183 = shalt.err (!%p2180_p13)
}
  0x87   :  { %127 = dma.hbm_to_vmem [thread:$0]  %s2614_s14, 4096, %s122_s30, [#allocation12], %s2634_s6, %s2634_s6, %s2633_s29  }
  0x88   :  { %2206 = dma.done.wait [#allocation3], 128  }
  0x89   :  { %2207 = vsyncadd [#allocation3], 4294967168 }
  0x8a   :  { %2208 = dma.done.wait [#allocation6], 2048  }
  0x8b   :  { %2209 = vsyncadd [#allocation6], 4294965248 }
  0x8c   :  { %2210 = dma.done.wait [#allocation9], 2048  }
  0x8d   :  { %2211 = vsyncadd [#allocation9], 4294965248 }
  0x8e   :  { %2212 = dma.done.wait [#allocation12], 8192  }
  0x8f   :  { %2213 = vsyncadd [#allocation12], 4294959104  ;;  %v2227_v0 = vmov 0.0   ;;  %vm2228_vm0 = vmmov 0   ;;  %v1897_v1 = vld [vmem:[#allocation7] sm:$0xff]   ;;  %v1898_v2 = vld [vmem:[#allocation7 + $0x8] sm:$0xff]   ;;  %v517_v35 = vlaneseq }
  0x90   :  { %1799 = vmatprep.subr.bf16.mxu0 %v2227_v0  ;;  %1815 = vmatprep.mubr.msk.bf16.mxu0 %vm2228_vm0, %v2227_v0  ;;  %v1899_v3 = vld [vmem:[#allocation7 + $0x10] sm:$0xff]   ;;  %v1900_v4 = vld [vmem:[#allocation7 + $0x18] sm:$0xff]   ;;  %v1901_v5 = vld [vmem:[#allocation7 + $0x20] sm:$0xff]   ;;  %vm418_vm1 = vcmask 1041409   ;;  %s2635_s6 = sld [smem:[#allocation21_spill]]  ;;  %v2230_v58 = vmov 0  }
  0x91   :  { %1819 = vmatprep.subr.bf16.mxu1 %v2227_v0  ;;  %1835 = vmatprep.mubr.msk.bf16.mxu1 %vm2228_vm0, %v2227_v0  ;;  %v1902_v6 = vld [vmem:[#allocation7 + $0x28] sm:$0xff]   ;;  %v1903_v7 = vld [vmem:[#allocation7 + $0x30] sm:$0xff]   ;;  %v1904_v8 = vld [vmem:[#allocation7 + $0x38] sm:$0xff]   ;;  %v2229_v33 = vmov 1966171168   ;;  %v2480_v37 = vshrl.u32 %v517_v35, 7 }
  0x92   :  { %1800 = vmatpush3.bf16.msra.mxu0 %v1897_v1  ;;  %v2448_v9 = vld [vmem:[#allocation2] sm:$0xf]  ;;  %v2450_v10 = vld [vmem:[#allocation2 + $0x4] sm:$0xf]  ;;  %v1908_v11 = vld [vmem:[#allocation5] sm:$0xff]   ;;  %v515_v34 = vunpack.c.l.s4 %v2229_v33  ;;  %1895 = vset.pattern.permute.xlu0 %v2230_v58  ;;  %vm592_vm2 = vcmask 58368  }
  0x93   :  { %1801 = vmatprep.subr.bf16.mxu0 %v2227_v0  ;;  %v2455_v12 = vcombine.low %v2448_v9, %v2450_v10  ;;  %v1630_v13 = vcombine.low %v2450_v10, %v2450_v10  ;;  %v1909_v14 = vld [vmem:[#allocation5 + $0x8] sm:$0xff]   ;;  %v1910_v16 = vld [vmem:[#allocation5 + $0x10] sm:$0xff]   ;;  %v1911_v18 = vld [vmem:[#allocation5 + $0x18] sm:$0xff]   ;;  %v1629_v21 = vcombine.low %v2448_v9, %v2448_v9  ;;  %v2487_v47 = vsub.s32 0, %v2480_v37  ;;  %1896 = vset.pattern.permute.xlu1 %v2230_v58  ;;  %s2231_s25 = smov [#allocation14]  }
  0x94   :  { %v1912_v19 = vld [vmem:[#allocation5 + $0x20] sm:$0xff]   ;;  %v1913_v20 = vld [vmem:[#allocation5 + $0x28] sm:$0xff]   ;;  %v1914_v22 = vld [vmem:[#allocation5 + $0x30] sm:$0xff]   ;;  %v516_v36 = vunpack.c.0.s8 %v515_v34  ;;  %vm791_vm3 = vcmask 1041408   ;;  %s1597_s18 = sshll.u32 %s2231_s25, 4  ;;  %s1598_s18 = int_to_ptr.vmem [resolvable:$true] %s1597_s18 }
  0x95   :  { %v416_v15 = vunpack.c.l.b16 %v1630_v13  ;;  %v415_v23 = vunpack.c.l.b16 %v1629_v21  ;;  %v1915_v24 = vld [vmem:[#allocation5 + $0x38] sm:$0xff]   ;;  %v581_v13 = vand.u32 127, %v517_v35  ;;  %v1924_v34 = vld [vmem:[#allocation10] sm:$0xff]   ;;  %v1925_v35 = vld [vmem:[#allocation10 + $0x8] sm:$0xff]   ;;  %s2184_s8 = scalar_lea.vmem %s1598_s18, 32  ;;  %p2189_p1 = scmp.lt.s32.totalorder %s1598_s18, %s1598_s18 }
  0x96   :  { %1802 = vmatpush3.bf16.msra.mxu0 %v1898_v2  ;;  %v1639_v27 = vld [vmem:[%s2635_s6] ss:$0 sm:$0xff]  ;;  %v1640_v28 = vld [vmem:[%s2635_s6 + $0x1] ss:$0 sm:$0xff]  ;;  %v519_v41 = vsub.s32 %v516_v36, %v2480_v37  ;;  %v1916_v2 = vld [vmem:[#allocation8] sm:$0xff]   ;;  %p2185_p0 = scmp.ne.s32.totalorder %s1598_s18, %s2184_s8  ;;  %p2190_p2 = scmp.lt.s32.totalorder %s2184_s8, %s2184_s8 }
  0x97   :  { %1803 = vmatprep.subr.bf16.mxu0 %v2227_v0  ;;  %v417_v17 = vrot.slane %v416_v15, 7  ;;  %563 = vbcast.lane.b32.xlu1 %v1639_v27, 256  ;;  %v1628_v38 = vld [vmem:[%s2603_s3] ss:$0 sm:$0xff] }
  0x98   :  { %v1609_v48 = vld [vmem:[%s2605_s5] ss:$0 sm:$0xff]  ;;  %1820 = vmatpush3.bf16.msra.mxu1 %v1916_v2  ;;  %p2191_p3 = por %p2190_p2, %p2189_p1 }
  0x99   :  { %v419_v25 = vsel %vm418_vm1, %v417_v17, %v415_v23  ;;  %1821 = vmatprep.subr.bf16.mxu1 %v2227_v0 }
  0x9a   :  { %1804 = vmatpush3.bf16.msra.mxu0 %v1899_v3  ;;  %v420_v26 = vpack.c.b16 %v419_v25, %v419_v25  ;;  %v1917_v3 = vld [vmem:[#allocation8 + $0x8] sm:$0xff]   ;;  %p2192_p4 = pnand %p2191_p3, %p2185_p0 }
  0x9b   :  { %1805 = vmatprep.subr.bf16.mxu0 %v2227_v0  ;;  %566 = vbcast.lane.b32.xlu1 %v1640_v28, 256 }
  0x9c   :  { %1822 = vmatpush3.bf16.msra.mxu1 %v1917_v3 }
  0x9d   :  { %1823 = vmatprep.subr.bf16.mxu1 %v2227_v0 }
  0x9e   :  { %1806 = vmatpush3.bf16.msra.mxu0 %v1900_v4  ;;  %v1918_v4 = vld [vmem:[#allocation8 + $0x10] sm:$0xff]  }
  0x9f   :  { %1807 = vmatprep.subr.bf16.mxu0 %v2227_v0 }
  0xa0   :  { %1824 = vmatpush3.bf16.msra.mxu1 %v1918_v4 }
  0xa1   :  { %1825 = vmatprep.subr.bf16.mxu1 %v2227_v0 }
  0xa2   :  { %1808 = vmatpush3.bf16.msra.mxu0 %v1901_v5  ;;  %v1919_v5 = vld [vmem:[#allocation8 + $0x18] sm:$0xff]  }
  0xa3   :  { %1809 = vmatprep.subr.bf16.mxu0 %v2227_v0 }
  0xa4   :  { %1826 = vmatpush3.bf16.msra.mxu1 %v1919_v5 }
  0xa5   :  { %1827 = vmatprep.subr.bf16.mxu1 %v2227_v0 }
  0xa6   :  { %1810 = vmatpush3.bf16.msra.mxu0 %v1902_v6  ;;  %v1920_v6 = vld [vmem:[#allocation8 + $0x20] sm:$0xff]  }
  0xa7   :  { %1811 = vmatprep.subr.bf16.mxu0 %v2227_v0 }
  0xa8   :  { %1828 = vmatpush3.bf16.msra.mxu1 %v1920_v6 }
  0xa9   :  { %1829 = vmatprep.subr.bf16.mxu1 %v2227_v0 }
  0xaa   :  { %1812 = vmatpush3.bf16.msra.mxu0 %v1903_v7  ;;  %v1921_v7 = vld [vmem:[#allocation8 + $0x28] sm:$0xff]  }
  0xab   :  { %1813 = vmatprep.subr.bf16.mxu0 %v2227_v0 }
  0xac   :  { %1830 = vmatpush3.bf16.msra.mxu1 %v1921_v7 }
  0xad   :  { %1831 = vmatprep.subr.bf16.mxu1 %v2227_v0 }
  0xae   :  { %1814 = vmatpush3.bf16.msra.mxu0 %v1904_v8  ;;  %v1922_v8 = vld [vmem:[#allocation8 + $0x30] sm:$0xff]  }
  0xaf   :  { %1839 = vmatprep.subr.bf16.mxu0 %v2227_v0 }
  0xb0   :  { %1832 = vmatpush3.bf16.msra.mxu1 %v1922_v8 }
  0xb1   :  { %1816 = vmatmul.mubr.bf16.vlgmr.msra.gmra.mrb[0].mxu0 %v2455_v12  ;;  %1833 = vmatprep.subr.bf16.mxu1 %v2227_v0 }
  0xb2   :  { %1840 = vmatpush3.bf16.msra.mxu0 %v1908_v11  ;;  %1855 = vmatprep.mubr.msk.bf16.mxu0 %vm2228_vm0, %v2227_v0  ;;  %v1923_v11 = vld [vmem:[#allocation8 + $0x38] sm:$0xff]  }
  0xb3   :  { %1841 = vmatprep.subr.bf16.mxu0 %v2227_v0 }
  0xb4   :  { %1834 = vmatpush3.bf16.msra.mxu1 %v1923_v11 }
  0xb5   :  { %1859 = vmatprep.subr.bf16.mxu1 %v2227_v0 }
  0xb6   :  { %1842 = vmatpush3.bf16.msra.mxu0 %v1909_v14  ;;  %v584_v14 = vsub.s32 %v581_v13, %v2480_v37 }
  0xb7   :  { %1843 = vmatprep.subr.bf16.mxu0 %v2227_v0  ;;  %1836 = vmatmul.mubr.bf16.vlgmr.msra.gmra.mrb[0].mxu1 %v2455_v12 }
  0xb8   :  { %1875 = vmatprep.mubr.msk.bf16.mxu1 %vm2228_vm0, %v2227_v0  ;;  %1860 = vmatpush3.bf16.msra.mxu1 %v1924_v34 }
  0xb9   :  { %1861 = vmatprep.subr.bf16.mxu1 %v2227_v0 }
  0xba   :  { %1844 = vmatpush3.bf16.msra.mxu0 %v1910_v16 }
  0xbb   :  { %1845 = vmatprep.subr.bf16.mxu0 %v2227_v0 }
  0xbc   :  { %1862 = vmatpush3.bf16.msra.mxu1 %v1925_v35 }
  0xbd   :  { %1863 = vmatprep.subr.bf16.mxu1 %v2227_v0 }
  0xbe   :  { %1846 = vmatpush3.bf16.msra.mxu0 %v1911_v18 }
  0xbf   :  { %1847 = vmatprep.subr.bf16.mxu0 %v2227_v0 }
  0xc2   :  { %1848 = vmatpush3.bf16.msra.mxu0 %v1912_v19 }
  0xc3   :  { %1849 = vmatprep.subr.bf16.mxu0 %v2227_v0 }
  0xc6   :  { %1850 = vmatpush3.bf16.msra.mxu0 %v1913_v20 }
  0xc7   :  { %1851 = vmatprep.subr.bf16.mxu0 %v2227_v0 }
  0xca   :  { %1852 = vmatpush3.bf16.msra.mxu0 %v1914_v22 }
  0xcb   :  { %1853 = vmatprep.subr.bf16.mxu0 %v2227_v0 }
  0xce   :  { %1854 = vmatpush3.bf16.msra.mxu0 %v1915_v24  ;;  %v603_v24 = vsub.s32 1, %v2480_v37 }
  0xd1   :  { %1856 = vmatmul.mubr.bf16.vlgmr.msra.gmra.mrb[4].mxu0 %v420_v26 }
  0xd2   :  { %1094 = vmatprep.mubr.bf16.mxu0 %v2230_v58 }
 0x109   :  { %v564_v59 = vpop.permute.xlu1 %563 }
 0x10d   :  { %v567_v62 = vpop.permute.xlu1 %566 }
 0x184   :  { %v269_v29 = vpop.f32.mrb[0].mxu0 }
 0x185   :  { %v1817_v30 = vpop.f32.mrb[1].mxu0  ;;  %v270_v51 = vadd.f32 %v1609_v48, %v269_v29 }
 0x186   :  { %v272_v31 = vpop.f32.mrb[2].mxu0 }
 0x187   :  { %v1818_v32 = vpop.f32.mrb[3].mxu0  ;;  %v273_v54 = vadd.f32 %v1609_v48, %v272_v31  ;;  %v1930_v48 = vld [vmem:[#allocation10 + $0x30] sm:$0xff]  }
 0x18a   :  { %v381_v21 = vpop.f32.mrb[0].mxu1 }
 0x18b   :  { %v1837_v22 = vpop.f32.mrb[1].mxu1 }
 0x18c   :  { %v384_v12 = vpop.f32.mrb[2].mxu1 }
 0x18d   :  { %v1838_v23 = vpop.f32.mrb[3].mxu1 }
 0x1a4   :  { %v504_v39 = vpop.f32.mrb[4].mxu0 }
 0x1a5   :  { %v505_v40 = vadd.f32 %v1628_v38, %v504_v39  ;;  %v1857_v42 = vpop.f32.mrb[5].mxu0 }
 0x1a6   :  { %v507_v43 = vpop.f32.mrb[6].mxu0 }
 0x1a7   :  { %v510_v44 = vmul.f32 0.088388346, %v505_v40  ;;  %v1858_v45 = vpop.f32.mrb[7].mxu0  ;;  %v1926_v43 = vld [vmem:[#allocation10 + $0x10] sm:$0xff]  }
 0x1a8   :  { %1864 = vmatpush3.bf16.msra.mxu1 %v1926_v43  ;;  %v1928_v45 = vld [vmem:[#allocation10 + $0x20] sm:$0xff]  }
 0x1a9   :  { %v520_v46 = vrot.slane %v510_v44, %v519_v41  ;;  %1865 = vmatprep.subr.bf16.mxu1 %v2227_v0  ;;  %v1927_v44 = vld [vmem:[#allocation10 + $0x18] sm:$0xff]   ;;  %v1932_v43 = vld [vmem:[#allocation11] ss:$16 sps:$4 sm:$0xff]  }
 0x1ab   :  { %v521_v49 = vcombine.high %v520_v46, %v520_v46  ;;  %v528_v50 = vrot.slane %v520_v46, %v519_v41  ;;  %v1929_v46 = vld [vmem:[#allocation10 + $0x28] sm:$0xff]  }
 0x1ac   :  { %1866 = vmatpush3.bf16.msra.mxu1 %v1927_v44  ;;  %v1935_v44 = vld [vmem:[#allocation11 + $0x8] ss:$16 sps:$4 sm:$0xff]  }
 0x1ad   :  { %v539_v52 = vrot.slane %v528_v50, %v2487_v47  ;;  %v535_v53 = vrot.slane %v521_v49, %v519_v41  ;;  %1867 = vmatprep.subr.bf16.mxu1 %v2227_v0  ;;  %v1931_v49 = vld [vmem:[#allocation10 + $0x38] sm:$0xff]  }
 0x1ae   :  { %v1619_v50 = vld [vmem:[%s2607_s7] ss:$0 sm:$0xff] }
 0x1af   :  { %v546_v55 = vmul.f32 %v539_v52, %v270_v51  ;;  %v543_v56 = vrot.slane %v535_v53, %v2487_v47  ;;  %v382_v51 = vadd.f32 %v1619_v50, %v381_v21  ;;  %v385_v52 = vadd.f32 %v1619_v50, %v384_v12  ;;  %v1946_v50 = vld [vmem:[#allocation11 + $0x44] ss:$16 sps:$4 sm:$0xff]  }
 0x1b0   :  { %1868 = vmatpush3.bf16.msra.mxu1 %v1928_v45  ;;  %v389_v21 = vunpack.c.l.bf16 %v2450_v10  ;;  %v1940_v45 = vld [vmem:[#allocation11 + $0x24] ss:$16 sps:$4 sm:$0xff]  }
 0x1b1   :  { %548 = vadd.xlane.f32.xlu0 %v546_v55  ;;  %v547_v57 = vmul.f32 %v543_v56, %v273_v54  ;;  %1869 = vmatprep.subr.bf16.mxu1 %v2227_v0 }
 0x1b4   :  { %1870 = vmatpush3.bf16.msra.mxu1 %v1929_v46  ;;  %v1943_v46 = vld [vmem:[#allocation11 + $0x2c] ss:$16 sps:$4 sm:$0xff]  }
 0x1b5   :  { %550 = vadd.xlane.f32.xlu0 %v547_v57  ;;  %1871 = vmatprep.subr.bf16.mxu1 %v2227_v0 }
 0x1b8   :  { %1872 = vmatpush3.bf16.msra.mxu1 %v1930_v48  ;;  %v1938_v48 = vld [vmem:[#allocation11 + $0x20] ss:$16 sps:$4 sm:$0xff]  }
 0x1b9   :  { %1873 = vmatprep.subr.bf16.mxu1 %v2227_v0 }
 0x1bc   :  { %1874 = vmatpush3.bf16.msra.mxu1 %v1931_v49  ;;  %v1941_v49 = vld [vmem:[#allocation11 + $0x28] ss:$16 sps:$4 sm:$0xff]  }
 0x23e   :  { %v549_v60 = vpop.xlane.xlu0 %548 }
 0x23f   :  { %v570_v61 = vadd.f32 %v564_v59, %v549_v60 }
 0x241   :  { %575 = vperm.xlu0 %1895, %v570_v61  }
 0x242   :  { %v551_v63 = vpop.xlane.xlu0 %550 }
 0x243   :  { %v571_v1 = vadd.f32 %v567_v62, %v551_v63 }
 0x245   :  { %578 = vperm.xlu1 %1896, %v571_v1  }
 0x2c0   :  { %v576_v15 = vpop.permute.xlu0 %575 }
 0x2c1   :  { %v585_v17 = vrot.slane %v576_v15, %v584_v14 }
 0x2c4   :  { %v579_v16 = vpop.permute.xlu1 %578 }
 0x2c5   :  { %v589_v18 = vrot.slane %v579_v16, %v584_v14 }
 0x2c7   :  { %v590_v19 = vsel %vm418_vm1, %v589_v18, %v585_v17 }
 0x2c8   :  { %v593_v20 = vsel %vm592_vm2, %v590_v19, -inf  ;;  %v1641_v19 = vld [vmem:[%s2609_s9] ss:$0 sm:$0xff] }
 0x2c9   :  { %594 = vmax.xlane.f32.xlu1 %v593_v20 }
 0x356   :  { %v595_v25 = vpop.xlane.xlu1 %594 }
 0x357   :  { %v600_v26 = vrot.slane %v595_v25, %v2487_v47  ;;  %v604_v27 = vrot.slane %v595_v25, %v603_v24  ;;  %v388_v25 = vunpack.c.l.bf16 %v2448_v9 }
 0x359   :  { %v607_v28 = vsub.f32 %v570_v61, %v600_v26  ;;  %v608_v29 = vsub.f32 %v571_v1, %v604_v27 }
 0x35b   :  { %v609_v30 = vmul.f32 1.442695, %v607_v28  ;;  %v611_v31 = vmul.f32 1.442695, %v608_v29 }
 0x35d   :  { %2012 = vpow2.f32 %v609_v30 }
 0x35e   :  { %2014 = vpow2.f32 %v611_v31 }
 0x367   :  { %v2013_v32 = vpop.eup %2012 }
 0x368   :  { %v2015_v33 = vpop.eup %2014  ;;  %616 = vperm.xlu1 %1896, %v2013_v32  }
 0x369   :  { %619 = vperm.xlu0 %1895, %v2015_v33  }
 0x3e7   :  { %v617_v36 = vpop.permute.xlu1 %616 }
 0x3e8   :  { %v620_v38 = vpop.permute.xlu0 %619  ;;  %v624_v39 = vrot.slane %v617_v36, %v584_v14  ;;  %v636_v53 = vmul.f32 %v617_v36, %v382_v51  ;;  %v1949_v51 = vld [vmem:[#allocation11 + $0x4c] ss:$16 sps:$4 sm:$0xff]  }
 0x3e9   :  { %v628_v40 = vrot.slane %v620_v38, %v584_v14  ;;  %v637_v54 = vmul.f32 %v620_v38, %v385_v52  ;;  %v1944_v52 = vld [vmem:[#allocation11 + $0x40] ss:$16 sps:$4 sm:$0xff]  }
 0x3ea   :  { %v638_v55 = vrot.slane %v636_v53, 4 }
 0x3eb   :  { %v629_v41 = vsel %vm418_vm1, %v628_v40, %v624_v39  ;;  %v644_v56 = vrot.slane %v637_v54, 4 }
 0x3ec   :  { %v631_v42 = vsel %vm592_vm2, %v629_v41, 0.0  ;;  %v639_v57 = vadd.f32 %v638_v55, %v636_v53  ;;  %v1934_v41 = vld [vmem:[#allocation11 + $0x4] ss:$16 sps:$4 sm:$0xff]   ;;  %v1947_v53 = vld [vmem:[#allocation11 + $0x48] ss:$16 sps:$4 sm:$0xff]  }
 0x3ed   :  { %632 = vadd.xlane.f32.xlu0 %v631_v42  ;;  %v645_v59 = vadd.f32 %v644_v56, %v637_v54  ;;  %v1937_v42 = vld [vmem:[#allocation11 + $0xc] ss:$16 sps:$4 sm:$0xff]   ;;  %1062 = vmatprep.subr.bf16.mxu0 %v1934_v41  ;;  %v1952_v54 = vld [vmem:[#allocation11 + $0x64] ss:$16 sps:$4 sm:$0xff]   ;;  %v1950_v56 = vld [vmem:[#allocation11 + $0x60] ss:$16 sps:$4 sm:$0xff]  }
 0x3ee   :  { %v640_v60 = vrot.slane %v639_v57, 2  ;;  %1103 = vmatprep.subr.bf16.mxu1 %v1937_v42  ;;  %1063 = vmatpush1.bf16.msra.mxu0 %v1932_v43  ;;  %v1955_v55 = vld [vmem:[#allocation11 + $0x6c] ss:$16 sps:$4 sm:$0xff]   ;;  %v1989_v41 = vld [vmem:[#allocation13 + $0xd0] sm:$0xff]  }
 0x3ef   :  { %v646_v61 = vrot.slane %v645_v59, 2  ;;  %1064 = vmatprep.subr.bf16.mxu0 %v1940_v45  ;;  %v1990_v42 = vld [vmem:[#allocation13 + $0x10] sm:$0xff]   ;;  %v1993_v45 = vld [vmem:[#allocation13 + $0xd8] sm:$0xff]  }
 0x3f0   :  { %v641_v63 = vadd.f32 %v640_v60, %v639_v57  ;;  %v1953_v57 = vld [vmem:[#allocation11 + $0x68] ss:$16 sps:$4 sm:$0xff]   ;;  %v1961_v60 = vld [vmem:[#allocation11 + $0x8c] ss:$16 sps:$4 sm:$0xff]   ;;  %v1991_v43 = vld [vmem:[#allocation13 + $0x90] sm:$0xff]  }
 0x3f1   :  { %v647_v1 = vadd.f32 %v646_v61, %v645_v59  ;;  %v1958_v59 = vld [vmem:[#allocation11 + $0x84] ss:$16 sps:$4 sm:$0xff]   ;;  %v1956_v61 = vld [vmem:[#allocation11 + $0x80] ss:$16 sps:$4 sm:$0xff]  }
 0x3f2   :  { %v642_v0 = vrot.slane %v641_v63, 1  ;;  %1065 = vmatpush1.bf16.msra.mxu0 %v1938_v48  ;;  %v1995_v48 = vld [vmem:[#allocation13 + $0x98] sm:$0xff]  }
 0x3f3   :  { %v648_v2 = vrot.slane %v647_v1, 1  ;;  %1066 = vmatprep.subr.bf16.mxu0 %v1946_v50  ;;  %v1997_v50 = vld [vmem:[#allocation13 + $0xe0] sm:$0xff]  }
 0x3f4   :  { %v643_v3 = vadd.f32 %v642_v0, %v641_v63  ;;  %v1964_v63 = vld [vmem:[#allocation11 + $0xa4] ss:$16 sps:$4 sm:$0xff]   ;;  %v1962_v0 = vld [vmem:[#allocation11 + $0xa0] ss:$16 sps:$4 sm:$0xff]  }
 0x3f5   :  { %v649_v5 = vadd.f32 %v648_v2, %v647_v1  ;;  %v1967_v1 = vld [vmem:[#allocation11 + $0xac] ss:$16 sps:$4 sm:$0xff]   ;;  %v1965_v2 = vld [vmem:[#allocation11 + $0xa8] ss:$16 sps:$4 sm:$0xff]  }
 0x3f6   :  { %1067 = vmatpush1.bf16.msra.mxu0 %v1944_v52  ;;  %v1999_v52 = vld [vmem:[#allocation13 + $0xa0] sm:$0xff]  }
 0x3f7   :  { %1068 = vmatprep.subr.bf16.mxu0 %v1952_v54  ;;  %v2001_v54 = vld [vmem:[#allocation13 + $0xe8] sm:$0xff]  }
 0x3fa   :  { %1069 = vmatpush1.bf16.msra.mxu0 %v1950_v56  ;;  %v2003_v56 = vld [vmem:[#allocation13 + $0xa8] sm:$0xff]  }
 0x3fb   :  { %1070 = vmatprep.subr.bf16.mxu0 %v1958_v59  ;;  %v2005_v59 = vld [vmem:[#allocation13 + $0xf0] sm:$0xff]  }
 0x3fe   :  { %1071 = vmatpush1.bf16.msra.mxu0 %v1956_v61  ;;  %v2007_v61 = vld [vmem:[#allocation13 + $0xb0] sm:$0xff]  }
 0x3ff   :  { %1072 = vmatprep.subr.bf16.mxu0 %v1964_v63  ;;  %v2009_v63 = vld [vmem:[#allocation13 + $0xf8] sm:$0xff]  }
 0x402   :  { %1073 = vmatpush1.bf16.msra.mxu0 %v1962_v0  ;;  %v2011_v0 = vld [vmem:[#allocation13 + $0xb8] sm:$0xff]  }
 0x47a   :  { %v633_v62 = vpop.xlane.xlu0 %632 }
 0x47b   :  { %2016 = vrcp.f32 %v633_v62  ;;  %v1959_v62 = vld [vmem:[#allocation11 + $0x88] ss:$16 sps:$4 sm:$0xff]  }
 0x485   :  { %v2017_v4 = vpop.eup %2016 }
 0x486   :  { %v652_v6 = vrot.slane %v2017_v4, 1  ;;  %v655_v7 = vmul.f32 %v2017_v4, %v643_v3  ;;  %v1970_v3 = vld [vmem:[#allocation11 + $0xc4] ss:$16 sps:$4 sm:$0xff]   ;;  %v1973_v4 = vld [vmem:[#allocation11 + $0xcc] ss:$16 sps:$4 sm:$0xff]  }
 0x487   :  { %1074 = vmatprep.subr.bf16.mxu0 %v1970_v3  ;;  %v872_v3 = vld [vmem:[%s2613_s13] sm:$0xf] }
 0x488   :  { %v656_v8 = vmul.f32 %v652_v6, %v649_v5  ;;  %v657_v11 = vpack.c.bf16 %v655_v7, %v655_v7  ;;  %v1968_v5 = vld [vmem:[#allocation11 + $0xc0] ss:$16 sps:$4 sm:$0xff]   ;;  %v1971_v6 = vld [vmem:[#allocation11 + $0xc8] ss:$16 sps:$4 sm:$0xff]   ;;  %v1976_v7 = vld [vmem:[#allocation11 + $0xe4] ss:$16 sps:$4 sm:$0xff]  }
 0x489   :  { %1075 = vmatpush1.bf16.msra.mxu0 %v1968_v5  ;;  %v877_v5 = vrot.slane %v872_v3, %v2487_v47 }
 0x48a   :  { %v658_v13 = vpack.c.bf16 %v656_v8, %v656_v8  ;;  %v684_v15 = vunpack.c.l.b16 %v657_v11  ;;  %v1979_v8 = vld [vmem:[#allocation11 + $0xec] ss:$16 sps:$4 sm:$0xff]   ;;  %v1974_v11 = vld [vmem:[#allocation11 + $0xe0] ss:$16 sps:$4 sm:$0xff]   ;;  %1076 = vmatprep.subr.bf16.mxu0 %v1976_v7  ;;  %v881_v7 = vrot.slane %v872_v3, %v603_v24 }
 0x48c   :  { %v685_v14 = vunpack.c.l.b16 %v658_v13  ;;  %v1977_v13 = vld [vmem:[#allocation11 + $0xe8] ss:$16 sps:$4 sm:$0xff]  }
 0x48d   :  { %1077 = vmatpush1.bf16.msra.mxu0 %v1974_v11 }
 0x48e   :  { %v686_v16 = vrot.slane %v685_v14, 7 }
 0x490   :  { %v687_v17 = vsel %vm418_vm1, %v686_v16, %v684_v15 }
 0x491   :  { %v688_v18 = vpack.c.b16 %v687_v17, %v687_v17 }
 0x493   :  { %1876 = vmatmul.mubr.bf16.vlgmr.msra.gmra.mrb[4].mxu1 %v688_v18  ;;  %v1650_v18 = vld [vmem:[%s2610_s10] ss:$0 sm:$0xff] }
 0x494   :  { %1135 = vmatprep.mubr.bf16.mxu1 %v2230_v58  ;;  %1104 = vmatpush1.bf16.msra.mxu1 %v1935_v44  ;;  %v1992_v44 = vld [vmem:[#allocation13 + $0x58] sm:$0xff]  }
 0x495   :  { %1105 = vmatprep.subr.bf16.mxu1 %v1943_v46  ;;  %v1994_v46 = vld [vmem:[#allocation13 + $0x18] sm:$0xff]  }
 0x498   :  { %1106 = vmatpush1.bf16.msra.mxu1 %v1941_v49  ;;  %v1996_v49 = vld [vmem:[#allocation13 + $0x60] sm:$0xff]  }
 0x499   :  { %1107 = vmatprep.subr.bf16.mxu1 %v1949_v51  ;;  %v1998_v51 = vld [vmem:[#allocation13 + $0x20] sm:$0xff]  }
 0x49c   :  { %1108 = vmatpush1.bf16.msra.mxu1 %v1947_v53  ;;  %v2000_v53 = vld [vmem:[#allocation13 + $0x68] sm:$0xff]  }
 0x49d   :  { %1109 = vmatprep.subr.bf16.mxu1 %v1955_v55  ;;  %v2002_v55 = vld [vmem:[#allocation13 + $0x28] sm:$0xff]  }
 0x4a0   :  { %1110 = vmatpush1.bf16.msra.mxu1 %v1953_v57  ;;  %v2004_v57 = vld [vmem:[#allocation13 + $0x70] sm:$0xff]  }
 0x4a1   :  { %1111 = vmatprep.subr.bf16.mxu1 %v1961_v60  ;;  %v2006_v60 = vld [vmem:[#allocation13 + $0x30] sm:$0xff]  }
 0x4a4   :  { %1112 = vmatpush1.bf16.msra.mxu1 %v1959_v62  ;;  %v2008_v62 = vld [vmem:[#allocation13 + $0x78] sm:$0xff]  }
 0x4a5   :  { %1113 = vmatprep.subr.bf16.mxu1 %v1967_v1  ;;  %v2010_v1 = vld [vmem:[#allocation13 + $0x38] sm:$0xff]  }
 0x4a8   :  { %1114 = vmatpush1.bf16.msra.mxu1 %v1965_v2  ;;  %v884_v2 = vsub.s32 2, %v2480_v37 }
 0x4a9   :  { %1115 = vmatprep.subr.bf16.mxu1 %v1973_v4  ;;  %v888_v4 = vsub.s32 3, %v2480_v37 }
 0x4ac   :  { %1116 = vmatpush1.bf16.msra.mxu1 %v1971_v6  ;;  %v885_v6 = vrot.slane %v872_v3, %v884_v2 }
 0x4ad   :  { %1117 = vmatprep.subr.bf16.mxu1 %v1979_v8  ;;  %v889_v8 = vrot.slane %v872_v3, %v888_v4 }
 0x4b0   :  { %1118 = vmatpush1.bf16.msra.mxu1 %v1977_v13 }
 0x566   :  { %v772_v20 = vpop.f32.mrb[4].mxu1 }
 0x567   :  { %v773_v22 = vadd.f32 %v1641_v19, %v772_v20  ;;  %v1877_v12 = vpop.f32.mrb[5].mxu1 }
 0x568   :  { %v775_v23 = vpop.f32.mrb[6].mxu1 }
 0x569   :  { %v779_v26 = vrot.slane %v773_v22, 1  ;;  %v1878_v27 = vpop.f32.mrb[7].mxu1  ;;  %v782_v29 = vadd.f32 %v773_v22, %v388_v25 }
 0x56b   :  { %v783_v28 = vadd.f32 %v779_v26, %v389_v21  ;;  %v1651_v21 = vld [vmem:[%s2611_s11] ss:$0 sm:$0xff] }
 0x56d   :  { %v788_v30 = vrot.slane %v783_v28, 7 }
 0x56f   :  { %v789_v58 = vsel %vm418_vm1, %v788_v30, %v782_v29 }
 0x570   :  { %v792_v31 = vsel %vm791_vm3, %v789_v58, 0.0 }
 0x571   :  { %793 = vadd.xlane.f32.xlu1 %v792_v31 }
 0x5fe   :  { %v794_v32 = vpop.xlane.xlu1 %793 }
 0x5ff   :  { %v796_v33 = vmul.f32 0.0078125, %v794_v32 }
 0x601   :  { %v798_v34 = vrot.slane %v796_v33, 1  ;;  %v2537_v10 = vsub.f32 %v782_v29, %v796_v33  ;;  %v1980_v33 = vld [vmem:[#allocation13 + $0x40] sm:$0xff]  }
 0x602   :  { %1755 = vmatprep.subr.bf16.mxu0 %v1980_v33 }
 0x603   :  { %v2539_v35 = vsub.f32 %v783_v28, %v798_v34  ;;  %v803_v36 = vmul.f32 %v2537_v10, %v2537_v10  ;;  %v1981_v34 = vld [vmem:[#allocation13 + $0xc0] sm:$0xff]  }
 0x604   :  { %1777 = vmatprep.subr.bf16.mxu1 %v1981_v34 }
 0x605   :  { %v804_v9 = vmul.f32 %v2539_v35, %v2539_v35 }
 0x607   :  { %v807_v38 = vrot.slane %v804_v9, 7  ;;  %v1984_v9 = vld [vmem:[#allocation13 + $0x48] sm:$0xff]  }
 0x609   :  { %v808_v39 = vsel %vm418_vm1, %v807_v38, %v803_v36  ;;  %v1985_v36 = vld [vmem:[#allocation13 + $0xc8] sm:$0xff]  }
 0x60a   :  { %v810_v40 = vsel %vm791_vm3, %v808_v39, 0.0  ;;  %v1986_v38 = vld [vmem:[#allocation13 + $0x8] sm:$0xff]  }
 0x60b   :  { %811 = vadd.xlane.f32.xlu0 %v810_v40  ;;  %v1987_v39 = vld [vmem:[#allocation13 + $0x88] sm:$0xff]   ;;  %v1988_v40 = vld [vmem:[#allocation13 + $0x50] sm:$0xff]  }
 0x698   :  { %v812_v14 = vpop.xlane.xlu0 %811 }
 0x699   :  { %v813_v15 = vmul.f32 0.0078125, %v812_v14 }
 0x69b   :  { %v814_v16 = vadd.f32 1e-05, %v813_v15 }
 0x69d   :  { %2018 = vrsqrt.f32 %v814_v16 }
 0x6a7   :  { %v2019_v17 = vpop.eup %2018 }
 0x6a8   :  { %v817_v19 = vrot.slane %v2019_v17, 1  ;;  %v820_v20 = vmul.f32 %v2019_v17, %v2537_v10  ;;  %v1982_v10 = vld [vmem:[#allocation13] sm:$0xff]  }
 0x6aa   :  { %v821_v22 = vmul.f32 %v817_v19, %v2539_v35  ;;  %v828_v12 = vmul.f32 %v1650_v18, %v820_v20  ;;  %v1983_v35 = vld [vmem:[#allocation13 + $0x80] sm:$0xff]  }
 0x6ac   :  { %v829_v23 = vmul.f32 %v1650_v18, %v821_v22  ;;  %v2555_v25 = vadd.f32 %v1651_v21, %v828_v12 }
 0x6ae   :  { %v2557_v26 = vadd.f32 %v1651_v21, %v829_v23  ;;  %v838_v27 = vpack.c.bf16 %v2555_v25, %v2555_v25 }
 0x6b0   :  { %v839_v28 = vpack.c.bf16 %v2557_v26, %v2557_v26  ;;  %v896_v30 = vunpack.c.l.b16 %v838_v27 }
 0x6b2   :  { %v897_v29 = vunpack.c.l.b16 %v839_v28 }
 0x6b4   :  { %v898_v58 = vrot.slane %v897_v29, 7 }
 0x6b6   :  { %v899_v31 = vsel %vm418_vm1, %v898_v58, %v896_v30 }
 0x6b7   :  { %v900_v32 = vpack.c.b16 %v899_v31, %v899_v31 }
 0x6b9   :  { %1095 = vmatmul.mubr.bf16.vlgmr.msra.gmra.mrb[8].mxu0 %v900_v32  ;;  %1136 = vmatmul.mubr.bf16.vlgmr.msra.gmra.mrb[8].mxu1 %v900_v32 }
 0x6ba   :  { %1756 = vmatpush3.bf16.msra.mxu0 %v1982_v10  ;;  %1778 = vmatpush3.bf16.msra.mxu1 %v1983_v35 }
 0x6bb   :  { %1757 = vmatprep.subr.bf16.mxu0 %v1984_v9  ;;  %1779 = vmatprep.subr.bf16.mxu1 %v1985_v36 }
 0x6be   :  { %1758 = vmatpush3.bf16.msra.mxu0 %v1986_v38  ;;  %1780 = vmatpush3.bf16.msra.mxu1 %v1987_v39 }
 0x6bf   :  { %1759 = vmatprep.subr.bf16.mxu0 %v1988_v40  ;;  %1781 = vmatprep.subr.bf16.mxu1 %v1989_v41 }
 0x6c2   :  { %1760 = vmatpush3.bf16.msra.mxu0 %v1990_v42  ;;  %1782 = vmatpush3.bf16.msra.mxu1 %v1991_v43 }
 0x6c3   :  { %1761 = vmatprep.subr.bf16.mxu0 %v1992_v44  ;;  %1783 = vmatprep.subr.bf16.mxu1 %v1993_v45 }
 0x6c6   :  { %1762 = vmatpush3.bf16.msra.mxu0 %v1994_v46  ;;  %1784 = vmatpush3.bf16.msra.mxu1 %v1995_v48 }
 0x6c7   :  { %1763 = vmatprep.subr.bf16.mxu0 %v1996_v49  ;;  %1785 = vmatprep.subr.bf16.mxu1 %v1997_v50 }
 0x6ca   :  { %1764 = vmatpush3.bf16.msra.mxu0 %v1998_v51  ;;  %1786 = vmatpush3.bf16.msra.mxu1 %v1999_v52 }
 0x6cb   :  { %1765 = vmatprep.subr.bf16.mxu0 %v2000_v53  ;;  %1787 = vmatprep.subr.bf16.mxu1 %v2001_v54 }
 0x6ce   :  { %1766 = vmatpush3.bf16.msra.mxu0 %v2002_v55  ;;  %1788 = vmatpush3.bf16.msra.mxu1 %v2003_v56 }
 0x6cf   :  { %1767 = vmatprep.subr.bf16.mxu0 %v2004_v57  ;;  %1789 = vmatprep.subr.bf16.mxu1 %v2005_v59 }
 0x6d2   :  { %1768 = vmatpush3.bf16.msra.mxu0 %v2006_v60  ;;  %1790 = vmatpush3.bf16.msra.mxu1 %v2007_v61 }
 0x6d3   :  { %1769 = vmatprep.subr.bf16.mxu0 %v2008_v62  ;;  %1791 = vmatprep.subr.bf16.mxu1 %v2009_v63 }
 0x6d6   :  { %1770 = vmatpush3.bf16.msra.mxu0 %v2010_v1  ;;  %1792 = vmatpush3.bf16.msra.mxu1 %v2011_v0  ;;  %v1684_v0 = vld [vmem:[%s2615_s15] ss:$0 sm:$0xff] }
 0x78c   :  { %v1096_v11 = vpop.f32.mrb[8].mxu0  ;;  %v1137_v13 = vpop.f32.mrb[8].mxu1 }
 0x78d   :  { %v1097_v14 = vadd.f32 %v1096_v11, %v877_v5  ;;  %v1138_v15 = vadd.f32 %v1137_v13, %v885_v6  ;;  %v1098_v16 = vpop.f32.mrb[9].mxu0  ;;  %v1139_v17 = vpop.f32.mrb[9].mxu1 }
 0x78e   :  { %v1099_v18 = vadd.f32 %v1098_v16, %v881_v7  ;;  %v1140_v19 = vadd.f32 %v1139_v17, %v889_v8  ;;  %v1100_v20 = vpop.f32.mrb[10].mxu0  ;;  %v1141_v21 = vpop.f32.mrb[10].mxu1 }
 0x78f   :  { %v1144_v22 = vmul.f32 %v1097_v14, %v1097_v14  ;;  %v1146_v12 = vmul.f32 %v1138_v15, %v1138_v15  ;;  %v1101_v23 = vpop.f32.mrb[11].mxu0  ;;  %v1142_v27 = vpop.f32.mrb[11].mxu1 }
 0x790   :  { %v1145_v47 = vmul.f32 %v1099_v18, %v1099_v18  ;;  %v1147_v28 = vmul.f32 %v1140_v19, %v1140_v19 }
 0x791   :  { %v1148_v29 = vmul.f32 %v1144_v22, %v1097_v14  ;;  %v1150_v37 = vmul.f32 %v1146_v12, %v1138_v15 }
 0x792   :  { %v1149_v24 = vmul.f32 %v1145_v47, %v1099_v18  ;;  %v1151_v30 = vmul.f32 %v1147_v28, %v1140_v19 }
 0x793   :  { %v1152_v58 = vmul.f32 0.044715, %v1148_v29  ;;  %v1154_v31 = vmul.f32 0.044715, %v1150_v37 }
 0x794   :  { %v1153_v32 = vmul.f32 0.044715, %v1149_v24  ;;  %v1155_v33 = vmul.f32 0.044715, %v1151_v30 }
 0x795   :  { %v1156_v34 = vadd.f32 %v1152_v58, %v1097_v14  ;;  %v1158_v10 = vadd.f32 %v1154_v31, %v1138_v15 }
 0x796   :  { %v1157_v35 = vadd.f32 %v1153_v32, %v1099_v18  ;;  %v1159_v9 = vadd.f32 %v1155_v33, %v1140_v19  ;;  %v1717_v33 = vld [vmem:[%s2616_s16] ss:$0 sm:$0xff] }
 0x797   :  { %v1160_v36 = vmul.f32 0.7978846, %v1156_v34  ;;  %v1162_v38 = vmul.f32 0.7978846, %v1158_v10 }
 0x798   :  { %v1161_v39 = vmul.f32 0.7978846, %v1157_v35  ;;  %v1163_v40 = vmul.f32 0.7978846, %v1159_v9  ;;  %v1718_v9 = vld [vmem:[%s2617_s17] ss:$0 sm:$0xff] }
 0x799   :  { %2020 = vtanh.f32 %v1160_v36 }
 0x79a   :  { %2022 = vtanh.f32 %v1162_v38 }
 0x79b   :  { %2024 = vtanh.f32 %v1161_v39 }
 0x79c   :  { %2026 = vtanh.f32 %v1163_v40 }
 0x7a3   :  { %v2021_v41 = vpop.eup %2020 }
 0x7a4   :  { %v2023_v42 = vpop.eup %2022  ;;  %v1168_v43 = vadd.f32 1.0, %v2021_v41 }
 0x7a5   :  { %v2025_v44 = vpop.eup %2024  ;;  %v1170_v45 = vadd.f32 1.0, %v2023_v42 }
 0x7a6   :  { %v2027_v46 = vpop.eup %2026  ;;  %v1169_v48 = vadd.f32 1.0, %v2025_v44  ;;  %v1172_v49 = vmul.f32 0.5, %v1168_v43 }
 0x7a7   :  { %v1171_v50 = vadd.f32 1.0, %v2027_v46  ;;  %v1174_v51 = vmul.f32 0.5, %v1170_v45 }
 0x7a8   :  { %v1173_v52 = vmul.f32 0.5, %v1169_v48  ;;  %v1176_v54 = vmul.f32 %v1172_v49, %v1097_v14 }
 0x7a9   :  { %v1175_v53 = vmul.f32 0.5, %v1171_v50  ;;  %v1178_v56 = vmul.f32 %v1174_v51, %v1138_v15 }
 0x7aa   :  { %v1177_v55 = vmul.f32 %v1173_v52, %v1099_v18  ;;  %v1180_v61 = vpack.c.bf16 %v1176_v54, %v1176_v54 }
 0x7ab   :  { %v1179_v57 = vmul.f32 %v1175_v53, %v1140_v19  ;;  %v1182_v62 = vpack.c.bf16 %v1178_v56, %v1178_v56 }
 0x7ac   :  { %v1181_v59 = vpack.c.bf16 %v1177_v55, %v1177_v55 }
 0x7ad   :  { %v1183_v60 = vpack.c.bf16 %v1179_v57, %v1179_v57 }
 0x7ae   :  { %1479 = vmatprep.mubr.bf16.mxu0 %v1181_v59 }
 0x7af   :  { %1519 = vmatprep.mubr.bf16.mxu1 %v1183_v60  ;;  %1480 = vmatmul.mubr.bf16.vlgmr.msra.gmra.mrb[12].mxu0 %v1180_v61 }
 0x7b0   :  { %1520 = vmatmul.mubr.bf16.vlgmr.msra.gmra.mrb[12].mxu1 %v1182_v62 }
 0x882   :  { %v1771_v63 = vpop.f32.mrb[12].mxu0 }
 0x883   :  { %v1793_v1 = vpop.f32.mrb[12].mxu1  ;;  %v1772_v2 = vpop.f32.mrb[13].mxu0 }
 0x884   :  { %v1773_v3 = vadd.f32 %v1772_v2, %v1771_v63  ;;  %v1794_v4 = vpop.f32.mrb[13].mxu1  ;;  %v1774_v5 = vpop.f32.mrb[14].mxu0 }
 0x885   :  { %v1795_v6 = vadd.f32 %v1794_v4, %v1793_v1  ;;  %v1796_v7 = vpop.f32.mrb[14].mxu1  ;;  %v1775_v8 = vpop.f32.mrb[15].mxu0 }
 0x886   :  { %v1482_v11 = vadd.f32 %v1773_v3, %v1684_v0  ;;  %v1797_v13 = vpop.f32.mrb[15].mxu1 }
 0x888   :  { %v1522_v14 = vadd.f32 %v1795_v6, %v1482_v11 }
 0x88a   :  { %v1528_v15 = vrot.slane %v1522_v14, 1  ;;  %v1531_v17 = vadd.f32 %v1522_v14, %v2555_v25 }
 0x88c   :  { %v1532_v16 = vadd.f32 %v1528_v15, %v2557_v26 }
 0x88e   :  { %v1537_v18 = vrot.slane %v1532_v16, 7 }
 0x890   :  { %v1538_v19 = vsel %vm418_vm1, %v1537_v18, %v1531_v17 }
 0x891   :  { %v1540_v20 = vsel %vm791_vm3, %v1538_v19, 0.0 }
 0x892   :  { %1541 = vadd.xlane.f32.xlu0 %v1540_v20 }
 0x91f   :  { %v1542_v21 = vpop.xlane.xlu0 %1541 }
 0x920   :  { %v1543_v22 = vmul.f32 0.0078125, %v1542_v21 }
 0x922   :  { %v1545_v12 = vrot.slane %v1543_v22, 1  ;;  %v1548_v23 = vsub.f32 %v1531_v17, %v1543_v22 }
 0x924   :  { %v1549_v27 = vsub.f32 %v1532_v16, %v1545_v12  ;;  %v1550_v28 = vmul.f32 %v1548_v23, %v1548_v23 }
 0x926   :  { %v1551_v47 = vmul.f32 %v1549_v27, %v1549_v27 }
 0x928   :  { %v1554_v29 = vrot.slane %v1551_v47, 7 }
 0x92a   :  { %v1555_v37 = vsel %vm418_vm1, %v1554_v29, %v1550_v28 }
 0x92b   :  { %v1557_v26 = vsel %vm791_vm3, %v1555_v37, 0.0 }
 0x92c   :  { %1558 = vadd.xlane.f32.xlu0 %v1557_v26 }
 0x9b9   :  { %v1559_v25 = vpop.xlane.xlu0 %1558 }
 0x9ba   :  { %v1560_v24 = vmul.f32 0.0078125, %v1559_v25 }
 0x9bc   :  { %v1561_v30 = vadd.f32 1e-05, %v1560_v24 }
 0x9be   :  { %2028 = vrsqrt.f32 %v1561_v30 }
 0x9c8   :  { %v2029_v58 = vpop.eup %2028 }
 0x9c9   :  { %v1564_v31 = vrot.slane %v2029_v58, 1  ;;  %v1567_v32 = vmul.f32 %v2029_v58, %v1548_v23 }
 0x9cb   :  { %v1568_v34 = vmul.f32 %v1564_v31, %v1549_v27  ;;  %v1575_v10 = vmul.f32 %v1717_v33, %v1567_v32 }
 0x9cd   :  { %v1576_v35 = vmul.f32 %v1717_v33, %v1568_v34  ;;  %v1583_v38 = vadd.f32 %v1718_v9, %v1575_v10 }
 0x9cf   :  { %v1584_v36 = vadd.f32 %v1718_v9, %v1576_v35 }
 0x9d1   :  { %v1587_v39 = vrot.slane %v1584_v36, 7 }
 0x9d3   :  { %v1588_v40 = vsel %vm418_vm1, %v1587_v39, %v1583_v38 }
 0x9d4   :  { %1590 = vst [vmem:[#allocation14] sm:$0x3] %v1588_v40 }
 0x9d5   :  { %2195 = shalt.err (!%p2192_p4)
}
 0x9d6   :  { %s2636_s14 = sld [smem:[#allocation23_spill]] }
 0x9dc   :  { %s2196_s17 = scalar_lea.hbm %s2636_s14, 32 }
 0x9dd   :  { %p2197_p5 = scmp.ne.s32.totalorder %s2636_s14, %s2196_s17  ;;  %p2200_p6 = scmp.lt.u32.totalorder %s2196_s17, %s2636_s14 }
 0x9df   :  { %p2202_p7 = pnand %p2200_p6, %p2197_p5 }
 0x9e1   :  { %2205 = shalt.err (!%p2202_p7)
}
 0x9e2   :  { %1600 = dma.vmem_to_hbm [thread:$0]  %s1598_s18, 32, %s2636_s14, [#allocation4]  }
 0x9e3   :  { %2214 = dma.done.wait [#allocation4], 32  }
 0x9e4   :  { %2215 = vsyncadd [#allocation4], 4294967264 }
 0x9e5   :  { %1604 = vsyncpa [#allocation3], 1 }
 0x9e6   :  { %1605 = vsyncpa [#allocation6], 1 }
 0x9e7   :  { %1606 = vsyncpa [#allocation9], 1 }
 0x9e8   :  { %1607 = vsyncpa [#allocation12], 1 }
 0x9e9   :  { %1608 = vsyncpa [#allocation4], 1 }

</bundles_post_ra>
